<compile_context>
chip_gen: v7x
topology: tpu7x:2x2x1
jax: 0.10.0
libtpu: 0.0.40
codegen_flags: <defaults>
</compile_context>

<pallas_src>
import jax
import jax.numpy as jnp
from jax import lax
from jax.experimental import pallas as pl
from jax.experimental.pallas import tpu as pltpu


_LANES = 128       # vreg lane width == in-kernel compute group size (batch rows)
_N_LAYERS = 8


def _round_up(x, m):
    return ((x + m - 1) // m) * m


# ---------------------------------------------------------------------------
# stride-0 sublane-broadcast load support probe (runs one tiny kernel, once)
# ---------------------------------------------------------------------------
_STRIDE0_BCAST_OK = None


def _stride0_broadcast_supported():
    """Does `ref[pl.ds(k, n, stride=0), :]` lower to a correct sublane-broadcast
    load on this JAX/Mosaic version?  Falls back gracefully if not."""
    global _STRIDE0_BCAST_OK
    if _STRIDE0_BCAST_OK is None:
        try:
            def probe(x_ref, o_ref):
                o_ref[...] = x_ref[pl.ds(1, 8, stride=0), :]

            x = jnp.arange(8 * _LANES, dtype=jnp.float32).reshape(8, _LANES)
            got = pl.pallas_call(
                probe,
                out_shape=jax.ShapeDtypeStruct((8, _LANES), jnp.float32),
            )(x)
            want = jnp.broadcast_to(x[1:2, :], (8, _LANES))
            _STRIDE0_BCAST_OK = bool(jnp.allclose(got, want))
        except Exception:
            _STRIDE0_BCAST_OK = False
    return _STRIDE0_BCAST_OK


def _row_broadcast(src_ref, k, rows, use_stride0):
    """Row `k` of `src_ref` replicated across `rows` sublanes -> (rows, lanes).

    Preferred path: stride-0 broadcast load (replication happens in the load
    unit, keeping it off the 2-slot XLU).  Fallback: explicit broadcast."""
    lanes = src_ref.shape[1]
    if use_stride0:
        return src_ref[pl.ds(k, rows, stride=0), :]
    return jnp.broadcast_to(src_ref[pl.ds(k, 1), :], (rows, lanes))


# ---------------------------------------------------------------------------
# Kernel
# ---------------------------------------------------------------------------
def _deep_ae_kernel(x_ref, *args, use_stride0):
    """x_ref:   (TB, in_dim)  batch-major input block.
    args:    16 packed param refs (per layer: weight (in, out_pad, 128) and
             bias (out_pad, 128)), then out_ref (TB, in_dim), then two
             (fmax, 128) f32 VMEM scratch buffers (activation ping-pong)."""
    param_refs = args[:2 * _N_LAYERS]
    out_ref = args[2 * _N_LAYERS]
    h_a, h_b = args[2 * _N_LAYERS + 1], args[2 * _N_LAYERS + 2]

    f_in = x_ref.shape[1]
    f_out = out_ref.shape[1]
    n_groups = x_ref.shape[0] // _LANES

    # Bias vregs are group-invariant: load once, outside the group loop.
    bias_vals = [param_refs[2 * li + 1][...] for li in range(_N_LAYERS)]

    def group_body(g, carry):
        base = pl.multiple_of(g * _LANES, _LANES)

        # Batch-major (128, f_in) group -> feature-major (f_in, 128) staging
        # (batch on the 128 lanes; one small in-kernel transpose per group).
        xg = x_ref[pl.ds(base, _LANES), :]
        h_a[:f_in, :] = jnp.transpose(xg)

        src, dst = h_a, h_b
        last = None
        for li in range(_N_LAYERS):
            w_ref = param_refs[2 * li]            # (in_dim, out_pad, 128)
            in_dim, out_pad, _ = w_ref.shape

            # Bias folded into the accumulator init; dual (even/odd k) accumulators.
            acc0 = bias_vals[li]
            acc1 = jnp.zeros_like(acc0)
            for k in range(in_dim):
                wk = w_ref[k]                                    # plain vld
                hk = _row_broadcast(src, k, out_pad, use_stride0)
                if k % 2 == 0:
                    acc0 = acc0 + wk * hk
                else:
                    acc1 = acc1 + wk * hk
            acc = acc0 + acc1

            if li < _N_LAYERS - 1:
                acc = jnp.tanh(acc)               # tanh on all but the last layer
                dst[:out_pad, :] = acc            # stage for the next layer
                src, dst = dst, src
            else:
                last = acc

        # Feature-major (f_out, 128) -> batch-major (128, f_out) and store.
        out_ref[pl.ds(base, _LANES), :] = jnp.transpose(last[:f_out, :])
        return carry

    lax.fori_loop(0, n_groups, group_body, 0)


# ---------------------------------------------------------------------------
# Host-side packing + wrapper
# ---------------------------------------------------------------------------
def _pack_params(params):
    """Pre-broadcast PyTorch-shaped params (w: (out, in), b: (out, 1)) into
    VMEM-friendly lane-broadcast form:
        weight -> (in, out_pad, 128) with wb[k, j, :] = w[j, k]
        bias   -> (out_pad, 128)     with bb[j, :]    = b[j]
    Padded rows (j >= out) are zero and never read by the next layer."""
    packed = []
    for li in range(len(params) // 2):
        w, b = params[2 * li], params[2 * li + 1]
        out_dim, in_dim = w.shape
        out_pad = _round_up(out_dim, 8)
        wb = jnp.zeros((in_dim, out_pad, _LANES), jnp.float32)
        wb = wb.at[:, :out_dim, :].set(
            jnp.broadcast_to(w.T.astype(jnp.float32)[:, :, None],
                             (in_dim, out_dim, _LANES)))
        bb = jnp.zeros((out_pad, _LANES), jnp.float32)
        bb = bb.at[:out_dim, :].set(
            jnp.broadcast_to(b.astype(jnp.float32), (out_dim, _LANES)))
        packed += [wb, bb]
    return packed


def deep_autoencoder_forward(x, params, *, tb_max=4096):
    """x: (batch, input_dim) f32 in natural batch-major layout.
    params: [w1, b1, ..., w8, b8] with weights (out, in) and biases (out, 1).
    Returns (batch, input_dim) f32."""
    batch, input_dim = x.shape
    assert len(params) == 2 * _N_LAYERS

    # Batch tile: multiple of 128 lanes, large enough to amortize the ~0.35us
    # per-grid-step overhead and keep DMAs near the HBM roofline.
    tb = min(tb_max, _round_up(batch, _LANES))
    bp = _round_up(batch, tb)
    # Prefer >= 2 grid steps for larger batches so 2-TC parts (v7x megacore)
    # keep both cores busy under dimension_semantics=("parallel",).
    if bp // tb < 2 and bp >= 2 * _LANES:
        tb = _round_up(bp // 2, _LANES)
        bp = _round_up(batch, tb)

    xp = x.astype(jnp.float32)
    if bp != batch:
        xp = jnp.pad(xp, ((0, bp - batch), (0, 0)))

    packed = _pack_params(params)

    # Scratch staging height = largest (padded) feature dimension in the net.
    dims = [input_dim] + [params[2 * li].shape[0] for li in range(_N_LAYERS)]
    fmax = _round_up(max(dims), 8)

    use_s0 = _stride0_broadcast_supported()

    def kernel(*refs):
        _deep_ae_kernel(*refs, use_stride0=use_s0)

    x_spec = pl.BlockSpec((tb, input_dim), lambda i: (i, 0))
    out_spec = pl.BlockSpec((tb, input_dim), lambda i: (i, 0))
    # Whole-array blocks with constant index_maps: fetched once, VMEM-resident.
    param_specs = [pl.BlockSpec(p.shape, lambda i, nd=p.ndim: (0,) * nd)
                   for p in packed]

    out = pl.pallas_call(
        kernel,
        out_shape=jax.ShapeDtypeStruct((bp, input_dim), jnp.float32),
        grid=(bp // tb,),
        in_specs=[x_spec] + param_specs,
        out_specs=out_spec,
        scratch_shapes=[pltpu.VMEM((fmax, _LANES), jnp.float32),
                        pltpu.VMEM((fmax, _LANES), jnp.float32)],
        compiler_params=pltpu.CompilerParams(
            dimension_semantics=("parallel",),
            vmem_limit_bytes=32 * 1024 * 1024),
    )(xp, *packed)

    return out[:batch] if bp != batch else out


# ---------------------------------------------------------------------------
# Parameter init (matches torch.nn.Linear defaults) and pure-JAX reference
# ---------------------------------------------------------------------------
def init_params(key, input_dim, bottleneck_dim):
    """PyTorch-shaped params: Linear(i, o) -> weight (o, i), bias (o, 1),
    init U(-1/sqrt(fan_in), 1/sqrt(fan_in))."""
    dims = [
        (input_dim, 4), (4, 8), (8, 5), (5, bottleneck_dim),      # encoder
        (bottleneck_dim, 6), (6, 10), (10, 8), (8, input_dim),    # decoder
    ]
    params = []
    for (i, o) in dims:
        key, kw, kb = jax.random.split(key, 3)
        bound = 1.0 / jnp.sqrt(i)
        w = jax.random.uniform(kw, (o, i), jnp.float32, -bound, bound)
        b = jax.random.uniform(kb, (o, 1), jnp.float32, -bound, bound)
        params += [w, b]
    return params


def reference_forward(x, params):
    """Pure-JAX reference of the same forward pass (batch-major)."""
    h = x
    n_layers = len(params) // 2
    for li in range(n_layers):
        w, b = params[2 * li], params[2 * li + 1]   # (out, in), (out, 1)
        h = h @ w.T + b[:, 0]
        if li != n_layers - 1:                      # no tanh on final decoder layer
            h = jnp.tanh(h)
    return h


if __name__ == "__main__":
    key = jax.random.PRNGKey(0)
    batch, input_dim, bottleneck_dim = 8, 16, 3

    key, kx = jax.random.split(key)
    x = jax.random.normal(kx, (batch, input_dim), jnp.float32)
    params = init_params(key, input_dim, bottleneck_dim)

    out = deep_autoencoder_forward(x, params)
    out = jax.block_until_ready(out)
    ref = reference_forward(x, params)
    assert out.shape == (batch, input_dim)
    assert jnp.allclose(out, ref, atol=1e-4, rtol=1e-4), "mismatch vs reference"

    # Second check: exercises batch padding, a 2-step grid and multiple
    # 128-row groups per tile.
    key, kx2 = jax.random.split(key)
    x2 = jax.random.normal(kx2, (384, input_dim), jnp.float32)
    out2 = jax.block_until_ready(deep_autoencoder_forward(x2, params))
    ref2 = reference_forward(x2, params)
    assert out2.shape == (384, input_dim)
    assert jnp.allclose(out2, ref2, atol=1e-4, rtol=1e-4), "mismatch vs reference (tiled)"

    print("KERNEL_OK")
</pallas_src>

<mosaic_0001>
module attributes {stable_mosaic.version = 11 : i64} {
  func.func @probe(%arg0: memref<8x128xf32, #tpu.memory_space<vmem>>, %arg1: memref<8x128xf32, #tpu.memory_space<vmem>>) attributes {dimension_semantics = [], scalar_prefetch = 0 : i64, scratch_operands = 0 : i64, tpu.core_type = #tpu.core_type<tc>} {
    %c1 = arith.constant 1 : index
    %c0 = arith.constant 0 : index
    %0 = tpu.strided_load %arg0[%c1, %c0] {strides = array<i32: 0, 1>} : memref<8x128xf32, #tpu.memory_space<vmem>>, vector<8x128xf32>
    %c0_0 = arith.constant 0 : index
    %c0_1 = arith.constant 0 : index
    %1 = vector.load %arg1[%c0_0, %c0_1] : memref<8x128xf32, #tpu.memory_space<vmem>>, vector<8x128xf32>
    tpu.vector_store %arg1[%c0_0, %c0_1], %0 {strides = array<i32>} : memref<8x128xf32, #tpu.memory_space<vmem>>, vector<8x128xf32>,
    return
  }
}

module attributes {stable_mosaic.version = 11 : i64} {
  func.func @kernel(%arg0: i32, %arg1: memref<128x16xf32, #tpu.memory_space<vmem>>, %arg2: memref<16x8x128xf32, #tpu.memory_space<vmem>>, %arg3: memref<8x128xf32, #tpu.memory_space<vmem>>, %arg4: memref<4x8x128xf32, #tpu.memory_space<vmem>>, %arg5: memref<8x128xf32, #tpu.memory_space<vmem>>, %arg6: memref<8x8x128xf32, #tpu.memory_space<vmem>>, %arg7: memref<8x128xf32, #tpu.memory_space<vmem>>, %arg8: memref<5x8x128xf32, #tpu.memory_space<vmem>>, %arg9: memref<8x128xf32, #tpu.memory_space<vmem>>, %arg10: memref<3x8x128xf32, #tpu.memory_space<vmem>>, %arg11: memref<8x128xf32, #tpu.memory_space<vmem>>, %arg12: memref<6x16x128xf32, #tpu.memory_space<vmem>>, %arg13: memref<16x128xf32, #tpu.memory_space<vmem>>, %arg14: memref<10x8x128xf32, #tpu.memory_space<vmem>>, %arg15: memref<8x128xf32, #tpu.memory_space<vmem>>, %arg16: memref<8x16x128xf32, #tpu.memory_space<vmem>>, %arg17: memref<16x128xf32, #tpu.memory_space<vmem>>, %arg18: memref<128x16xf32, #tpu.memory_space<vmem>>, %arg19: memref<16x128xf32, #tpu.memory_space<vmem>>, %arg20: memref<16x128xf32, #tpu.memory_space<vmem>>) attributes {dimension_semantics = [#tpu.dimension_semantics<parallel>], iteration_bounds = array<i64: 1>, scalar_prefetch = 0 : i64, scratch_operands = 2 : i64, tpu.core_type = #tpu.core_type<tc>, window_params = [{transform_indices = @transform_0, window_bounds = array<i64: 128, 16>}, {pipeline_mode = #tpu.pipeline_mode<synchronous>, transform_indices = @transform_1, window_bounds = array<i64: 16, 8, 128>}, {pipeline_mode = #tpu.pipeline_mode<synchronous>, transform_indices = @transform_2, window_bounds = array<i64: 8, 128>}, {pipeline_mode = #tpu.pipeline_mode<synchronous>, transform_indices = @transform_3, window_bounds = array<i64: 4, 8, 128>}, {pipeline_mode = #tpu.pipeline_mode<synchronous>, transform_indices = @transform_4, window_bounds = array<i64: 8, 128>}, {pipeline_mode = #tpu.pipeline_mode<synchronous>, transform_indices = @transform_5, window_bounds = array<i64: 8, 8, 128>}, {pipeline_mode = #tpu.pipeline_mode<synchronous>, transform_indices = @transform_6, window_bounds = array<i64: 8, 128>}, {pipeline_mode = #tpu.pipeline_mode<synchronous>, transform_indices = @transform_7, window_bounds = array<i64: 5, 8, 128>}, {pipeline_mode = #tpu.pipeline_mode<synchronous>, transform_indices = @transform_8, window_bounds = array<i64: 8, 128>}, {pipeline_mode = #tpu.pipeline_mode<synchronous>, transform_indices = @transform_9, window_bounds = array<i64: 3, 8, 128>}, {pipeline_mode = #tpu.pipeline_mode<synchronous>, transform_indices = @transform_10, window_bounds = array<i64: 8, 128>}, {pipeline_mode = #tpu.pipeline_mode<synchronous>, transform_indices = @transform_11, window_bounds = array<i64: 6, 16, 128>}, {pipeline_mode = #tpu.pipeline_mode<synchronous>, transform_indices = @transform_12, window_bounds = array<i64: 16, 128>}, {pipeline_mode = #tpu.pipeline_mode<synchronous>, transform_indices = @transform_13, window_bounds = array<i64: 10, 8, 128>}, {pipeline_mode = #tpu.pipeline_mode<synchronous>, transform_indices = @transform_14, window_bounds = array<i64: 8, 128>}, {pipeline_mode = #tpu.pipeline_mode<synchronous>, transform_indices = @transform_15, window_bounds = array<i64: 8, 16, 128>}, {pipeline_mode = #tpu.pipeline_mode<synchronous>, transform_indices = @transform_16, window_bounds = array<i64: 16, 128>}, {transform_indices = @transform_17, window_bounds = array<i64: 128, 16>}]} {
    %c0 = arith.constant 0 : index
    %c0_0 = arith.constant 0 : index
    %0 = vector.load %arg3[%c0, %c0_0] : memref<8x128xf32, #tpu.memory_space<vmem>>, vector<8x128xf32>
    %c0_1 = arith.constant 0 : index
    %c0_2 = arith.constant 0 : index
    %1 = vector.load %arg5[%c0_1, %c0_2] : memref<8x128xf32, #tpu.memory_space<vmem>>, vector<8x128xf32>
    %c0_3 = arith.constant 0 : index
    %c0_4 = arith.constant 0 : index
    %2 = vector.load %arg7[%c0_3, %c0_4] : memref<8x128xf32, #tpu.memory_space<vmem>>, vector<8x128xf32>
    %c0_5 = arith.constant 0 : index
    %c0_6 = arith.constant 0 : index
    %3 = vector.load %arg9[%c0_5, %c0_6] : memref<8x128xf32, #tpu.memory_space<vmem>>, vector<8x128xf32>
    %c0_7 = arith.constant 0 : index
    %c0_8 = arith.constant 0 : index
    %4 = vector.load %arg11[%c0_7, %c0_8] : memref<8x128xf32, #tpu.memory_space<vmem>>, vector<8x128xf32>
    %c0_9 = arith.constant 0 : index
    %c0_10 = arith.constant 0 : index
    %5 = vector.load %arg13[%c0_9, %c0_10] : memref<16x128xf32, #tpu.memory_space<vmem>>, vector<16x128xf32>
    %c0_11 = arith.constant 0 : index
    %c0_12 = arith.constant 0 : index
    %6 = vector.load %arg15[%c0_11, %c0_12] : memref<8x128xf32, #tpu.memory_space<vmem>>, vector<8x128xf32>
    %c0_13 = arith.constant 0 : index
    %c0_14 = arith.constant 0 : index
    %7 = vector.load %arg17[%c0_13, %c0_14] : memref<16x128xf32, #tpu.memory_space<vmem>>, vector<16x128xf32>
    %c0_i32 = arith.constant 0 : i32
    %c128_i32 = arith.constant 128 : i32
    %8 = arith.muli %c0_i32, %c128_i32 : i32
    %9 = tpu.assume_multiple %8, 128 : i32
    %10 = arith.index_cast %9 : i32 to index
    %c0_15 = arith.constant 0 : index
    %11 = vector.load %arg1[%10, %c0_15] : memref<128x16xf32, #tpu.memory_space<vmem>>, vector<128x16xf32>
    %12 = tpu.transpose %11, [1, 0] : vector<128x16xf32> -> vector<16x128xf32>
    %c0_16 = arith.constant 0 : index
    %c0_17 = arith.constant 0 : index
    %13 = vector.load %arg19[%c0_16, %c0_17] : memref<16x128xf32, #tpu.memory_space<vmem>>, vector<16x128xf32>
    tpu.vector_store %arg19[%c0_16, %c0_17], %12 {strides = array<i32>} : memref<16x128xf32, #tpu.memory_space<vmem>>, vector<16x128xf32>,
    %cst = arith.constant 0.000000e+00 : f32
    %14 = vector.broadcast %cst : f32 to vector<8x128xf32>
    %c0_18 = arith.constant 0 : index
    %c0_19 = arith.constant 0 : index
    %c0_20 = arith.constant 0 : index
    %15 = vector.load %arg2[%c0_18, %c0_19, %c0_20] : memref<16x8x128xf32, #tpu.memory_space<vmem>>, vector<1x8x128xf32>
    %16 = vector.shape_cast %15 : vector<1x8x128xf32> to vector<8x128xf32>
    %c0_21 = arith.constant 0 : index
    %c0_22 = arith.constant 0 : index
    %17 = vector.load %arg19[%c0_21, %c0_22] : memref<16x128xf32, #tpu.memory_space<vmem>>, vector<1x128xf32>
    %18 = vector.shape_cast %17 : vector<1x128xf32> to vector<1x128xf32>
    %19 = vector.broadcast %18 : vector<1x128xf32> to vector<8x128xf32>
    %20 = arith.mulf %16, %19 : vector<8x128xf32>
    %21 = arith.addf %0, %20 : vector<8x128xf32>
    %c1 = arith.constant 1 : index
    %c0_23 = arith.constant 0 : index
    %c0_24 = arith.constant 0 : index
    %22 = vector.load %arg2[%c1, %c0_23, %c0_24] : memref<16x8x128xf32, #tpu.memory_space<vmem>>, vector<1x8x128xf32>
    %23 = vector.shape_cast %22 : vector<1x8x128xf32> to vector<8x128xf32>
    %c1_25 = arith.constant 1 : index
    %c0_26 = arith.constant 0 : index
    %24 = vector.load %arg19[%c1_25, %c0_26] : memref<16x128xf32, #tpu.memory_space<vmem>>, vector<1x128xf32>
    %25 = vector.shape_cast %24 : vector<1x128xf32> to vector<1x128xf32>
    %26 = vector.broadcast %25 : vector<1x128xf32> to vector<8x128xf32>
    %27 = arith.mulf %23, %26 : vector<8x128xf32>
    %28 = arith.addf %14, %27 : vector<8x128xf32>
    %c2 = arith.constant 2 : index
    %c0_27 = arith.constant 0 : index
    %c0_28 = arith.constant 0 : index
    %29 = vector.load %arg2[%c2, %c0_27, %c0_28] : memref<16x8x128xf32, #tpu.memory_space<vmem>>, vector<1x8x128xf32>
    %30 = vector.shape_cast %29 : vector<1x8x128xf32> to vector<8x128xf32>
    %c2_29 = arith.constant 2 : index
    %c0_30 = arith.constant 0 : index
    %31 = vector.load %arg19[%c2_29, %c0_30] : memref<16x128xf32, #tpu.memory_space<vmem>>, vector<1x128xf32>
    %32 = vector.shape_cast %31 : vector<1x128xf32> to vector<1x128xf32>
    %33 = vector.broadcast %32 : vector<1x128xf32> to vector<8x128xf32>
    %34 = arith.mulf %30, %33 : vector<8x128xf32>
    %35 = arith.addf %21, %34 : vector<8x128xf32>
    %c3 = arith.constant 3 : index
    %c0_31 = arith.constant 0 : index
    %c0_32 = arith.constant 0 : index
    %36 = vector.load %arg2[%c3, %c0_31, %c0_32] : memref<16x8x128xf32, #tpu.memory_space<vmem>>, vector<1x8x128xf32>
    %37 = vector.shape_cast %36 : vector<1x8x128xf32> to vector<8x128xf32>
    %c3_33 = arith.constant 3 : index
    %c0_34 = arith.constant 0 : index
    %38 = vector.load %arg19[%c3_33, %c0_34] : memref<16x128xf32, #tpu.memory_space<vmem>>, vector<1x128xf32>
    %39 = vector.shape_cast %38 : vector<1x128xf32> to vector<1x128xf32>
    %40 = vector.broadcast %39 : vector<1x128xf32> to vector<8x128xf32>
    %41 = arith.mulf %37, %40 : vector<8x128xf32>
    %42 = arith.addf %28, %41 : vector<8x128xf32>
    %c4 = arith.constant 4 : index
    %c0_35 = arith.constant 0 : index
    %c0_36 = arith.constant 0 : index
    %43 = vector.load %arg2[%c4, %c0_35, %c0_36] : memref<16x8x128xf32, #tpu.memory_space<vmem>>, vector<1x8x128xf32>
    %44 = vector.shape_cast %43 : vector<1x8x128xf32> to vector<8x128xf32>
    %c4_37 = arith.constant 4 : index
    %c0_38 = arith.constant 0 : index
    %45 = vector.load %arg19[%c4_37, %c0_38] : memref<16x128xf32, #tpu.memory_space<vmem>>, vector<1x128xf32>
    %46 = vector.shape_cast %45 : vector<1x128xf32> to vector<1x128xf32>
    %47 = vector.broadcast %46 : vector<1x128xf32> to vector<8x128xf32>
    %48 = arith.mulf %44, %47 : vector<8x128xf32>
    %49 = arith.addf %35, %48 : vector<8x128xf32>
    %c5 = arith.constant 5 : index
    %c0_39 = arith.constant 0 : index
    %c0_40 = arith.constant 0 : index
    %50 = vector.load %arg2[%c5, %c0_39, %c0_40] : memref<16x8x128xf32, #tpu.memory_space<vmem>>, vector<1x8x128xf32>
    %51 = vector.shape_cast %50 : vector<1x8x128xf32> to vector<8x128xf32>
    %c5_41 = arith.constant 5 : index
    %c0_42 = arith.constant 0 : index
    %52 = vector.load %arg19[%c5_41, %c0_42] : memref<16x128xf32, #tpu.memory_space<vmem>>, vector<1x128xf32>
    %53 = vector.shape_cast %52 : vector<1x128xf32> to vector<1x128xf32>
    %54 = vector.broadcast %53 : vector<1x128xf32> to vector<8x128xf32>
    %55 = arith.mulf %51, %54 : vector<8x128xf32>
    %56 = arith.addf %42, %55 : vector<8x128xf32>
    %c6 = arith.constant 6 : index
    %c0_43 = arith.constant 0 : index
    %c0_44 = arith.constant 0 : index
    %57 = vector.load %arg2[%c6, %c0_43, %c0_44] : memref<16x8x128xf32, #tpu.memory_space<vmem>>, vector<1x8x128xf32>
    %58 = vector.shape_cast %57 : vector<1x8x128xf32> to vector<8x128xf32>
    %c6_45 = arith.constant 6 : index
    %c0_46 = arith.constant 0 : index
    %59 = vector.load %arg19[%c6_45, %c0_46] : memref<16x128xf32, #tpu.memory_space<vmem>>, vector<1x128xf32>
    %60 = vector.shape_cast %59 : vector<1x128xf32> to vector<1x128xf32>
    %61 = vector.broadcast %60 : vector<1x128xf32> to vector<8x128xf32>
    %62 = arith.mulf %58, %61 : vector<8x128xf32>
    %63 = arith.addf %49, %62 : vector<8x128xf32>
    %c7 = arith.constant 7 : index
    %c0_47 = arith.constant 0 : index
    %c0_48 = arith.constant 0 : index
    %64 = vector.load %arg2[%c7, %c0_47, %c0_48] : memref<16x8x128xf32, #tpu.memory_space<vmem>>, vector<1x8x128xf32>
    %65 = vector.shape_cast %64 : vector<1x8x128xf32> to vector<8x128xf32>
    %c7_49 = arith.constant 7 : index
    %c0_50 = arith.constant 0 : index
    %66 = vector.load %arg19[%c7_49, %c0_50] : memref<16x128xf32, #tpu.memory_space<vmem>>, vector<1x128xf32>
    %67 = vector.shape_cast %66 : vector<1x128xf32> to vector<1x128xf32>
    %68 = vector.broadcast %67 : vector<1x128xf32> to vector<8x128xf32>
    %69 = arith.mulf %65, %68 : vector<8x128xf32>
    %70 = arith.addf %56, %69 : vector<8x128xf32>
    %c8 = arith.constant 8 : index
    %c0_51 = arith.constant 0 : index
    %c0_52 = arith.constant 0 : index
    %71 = vector.load %arg2[%c8, %c0_51, %c0_52] : memref<16x8x128xf32, #tpu.memory_space<vmem>>, vector<1x8x128xf32>
    %72 = vector.shape_cast %71 : vector<1x8x128xf32> to vector<8x128xf32>
    %c8_53 = arith.constant 8 : index
    %c0_54 = arith.constant 0 : index
    %73 = vector.load %arg19[%c8_53, %c0_54] : memref<16x128xf32, #tpu.memory_space<vmem>>, vector<1x128xf32>
    %74 = vector.shape_cast %73 : vector<1x128xf32> to vector<1x128xf32>
    %75 = vector.broadcast %74 : vector<1x128xf32> to vector<8x128xf32>
    %76 = arith.mulf %72, %75 : vector<8x128xf32>
    %77 = arith.addf %63, %76 : vector<8x128xf32>
    %c9 = arith.constant 9 : index
    %c0_55 = arith.constant 0 : index
    %c0_56 = arith.constant 0 : index
    %78 = vector.load %arg2[%c9, %c0_55, %c0_56] : memref<16x8x128xf32, #tpu.memory_space<vmem>>, vector<1x8x128xf32>
    %79 = vector.shape_cast %78 : vector<1x8x128xf32> to vector<8x128xf32>
    %c9_57 = arith.constant 9 : index
    %c0_58 = arith.constant 0 : index
    %80 = vector.load %arg19[%c9_57, %c0_58] : memref<16x128xf32, #tpu.memory_space<vmem>>, vector<1x128xf32>
    %81 = vector.shape_cast %80 : vector<1x128xf32> to vector<1x128xf32>
    %82 = vector.broadcast %81 : vector<1x128xf32> to vector<8x128xf32>
    %83 = arith.mulf %79, %82 : vector<8x128xf32>
    %84 = arith.addf %70, %83 : vector<8x128xf32>
    %c10 = arith.constant 10 : index
    %c0_59 = arith.constant 0 : index
    %c0_60 = arith.constant 0 : index
    %85 = vector.load %arg2[%c10, %c0_59, %c0_60] : memref<16x8x128xf32, #tpu.memory_space<vmem>>, vector<1x8x128xf32>
    %86 = vector.shape_cast %85 : vector<1x8x128xf32> to vector<8x128xf32>
    %c10_61 = arith.constant 10 : index
    %c0_62 = arith.constant 0 : index
    %87 = vector.load %arg19[%c10_61, %c0_62] : memref<16x128xf32, #tpu.memory_space<vmem>>, vector<1x128xf32>
    %88 = vector.shape_cast %87 : vector<1x128xf32> to vector<1x128xf32>
    %89 = vector.broadcast %88 : vector<1x128xf32> to vector<8x128xf32>
    %90 = arith.mulf %86, %89 : vector<8x128xf32>
    %91 = arith.addf %77, %90 : vector<8x128xf32>
    %c11 = arith.constant 11 : index
    %c0_63 = arith.constant 0 : index
    %c0_64 = arith.constant 0 : index
    %92 = vector.load %arg2[%c11, %c0_63, %c0_64] : memref<16x8x128xf32, #tpu.memory_space<vmem>>, vector<1x8x128xf32>
    %93 = vector.shape_cast %92 : vector<1x8x128xf32> to vector<8x128xf32>
    %c11_65 = arith.constant 11 : index
    %c0_66 = arith.constant 0 : index
    %94 = vector.load %arg19[%c11_65, %c0_66] : memref<16x128xf32, #tpu.memory_space<vmem>>, vector<1x128xf32>
    %95 = vector.shape_cast %94 : vector<1x128xf32> to vector<1x128xf32>
    %96 = vector.broadcast %95 : vector<1x128xf32> to vector<8x128xf32>
    %97 = arith.mulf %93, %96 : vector<8x128xf32>
    %98 = arith.addf %84, %97 : vector<8x128xf32>
    %c12 = arith.constant 12 : index
    %c0_67 = arith.constant 0 : index
    %c0_68 = arith.constant 0 : index
    %99 = vector.load %arg2[%c12, %c0_67, %c0_68] : memref<16x8x128xf32, #tpu.memory_space<vmem>>, vector<1x8x128xf32>
    %100 = vector.shape_cast %99 : vector<1x8x128xf32> to vector<8x128xf32>
    %c12_69 = arith.constant 12 : index
    %c0_70 = arith.constant 0 : index
    %101 = vector.load %arg19[%c12_69, %c0_70] : memref<16x128xf32, #tpu.memory_space<vmem>>, vector<1x128xf32>
    %102 = vector.shape_cast %101 : vector<1x128xf32> to vector<1x128xf32>
    %103 = vector.broadcast %102 : vector<1x128xf32> to vector<8x128xf32>
    %104 = arith.mulf %100, %103 : vector<8x128xf32>
    %105 = arith.addf %91, %104 : vector<8x128xf32>
    %c13 = arith.constant 13 : index
    %c0_71 = arith.constant 0 : index
    %c0_72 = arith.constant 0 : index
    %106 = vector.load %arg2[%c13, %c0_71, %c0_72] : memref<16x8x128xf32, #tpu.memory_space<vmem>>, vector<1x8x128xf32>
    %107 = vector.shape_cast %106 : vector<1x8x128xf32> to vector<8x128xf32>
    %c13_73 = arith.constant 13 : index
    %c0_74 = arith.constant 0 : index
    %108 = vector.load %arg19[%c13_73, %c0_74] : memref<16x128xf32, #tpu.memory_space<vmem>>, vector<1x128xf32>
    %109 = vector.shape_cast %108 : vector<1x128xf32> to vector<1x128xf32>
    %110 = vector.broadcast %109 : vector<1x128xf32> to vector<8x128xf32>
    %111 = arith.mulf %107, %110 : vector<8x128xf32>
    %112 = arith.addf %98, %111 : vector<8x128xf32>
    %c14 = arith.constant 14 : index
    %c0_75 = arith.constant 0 : index
    %c0_76 = arith.constant 0 : index
    %113 = vector.load %arg2[%c14, %c0_75, %c0_76] : memref<16x8x128xf32, #tpu.memory_space<vmem>>, vector<1x8x128xf32>
    %114 = vector.shape_cast %113 : vector<1x8x128xf32> to vector<8x128xf32>
    %c14_77 = arith.constant 14 : index
    %c0_78 = arith.constant 0 : index
    %115 = vector.load %arg19[%c14_77, %c0_78] : memref<16x128xf32, #tpu.memory_space<vmem>>, vector<1x128xf32>
    %116 = vector.shape_cast %115 : vector<1x128xf32> to vector<1x128xf32>
    %117 = vector.broadcast %116 : vector<1x128xf32> to vector<8x128xf32>
    %118 = arith.mulf %114, %117 : vector<8x128xf32>
    %119 = arith.addf %105, %118 : vector<8x128xf32>
    %c15 = arith.constant 15 : index
    %c0_79 = arith.constant 0 : index
    %c0_80 = arith.constant 0 : index
    %120 = vector.load %arg2[%c15, %c0_79, %c0_80] : memref<16x8x128xf32, #tpu.memory_space<vmem>>, vector<1x8x128xf32>
    %121 = vector.shape_cast %120 : vector<1x8x128xf32> to vector<8x128xf32>
    %c15_81 = arith.constant 15 : index
    %c0_82 = arith.constant 0 : index
    %122 = vector.load %arg19[%c15_81, %c0_82] : memref<16x128xf32, #tpu.memory_space<vmem>>, vector<1x128xf32>
    %123 = vector.shape_cast %122 : vector<1x128xf32> to vector<1x128xf32>
    %124 = vector.broadcast %123 : vector<1x128xf32> to vector<8x128xf32>
    %125 = arith.mulf %121, %124 : vector<8x128xf32>
    %126 = arith.addf %112, %125 : vector<8x128xf32>
    %127 = arith.addf %119, %126 : vector<8x128xf32>
    %128 = math.tanh %127 : vector<8x128xf32>
    %c0_83 = arith.constant 0 : index
    %c0_84 = arith.constant 0 : index
    %129 = vector.load %arg20[%c0_83, %c0_84] : memref<16x128xf32, #tpu.memory_space<vmem>>, vector<8x128xf32>
    tpu.vector_store %arg20[%c0_83, %c0_84], %128 {strides = array<i32>} : memref<16x128xf32, #tpu.memory_space<vmem>>, vector<8x128xf32>,
    %cst_85 = arith.constant 0.000000e+00 : f32
    %130 = vector.broadcast %cst_85 : f32 to vector<8x128xf32>
    %c0_86 = arith.constant 0 : index
    %c0_87 = arith.constant 0 : index
    %c0_88 = arith.constant 0 : index
    %131 = vector.load %arg4[%c0_86, %c0_87, %c0_88] : memref<4x8x128xf32, #tpu.memory_space<vmem>>, vector<1x8x128xf32>
    %132 = vector.shape_cast %131 : vector<1x8x128xf32> to vector<8x128xf32>
    %c0_89 = arith.constant 0 : index
    %c0_90 = arith.constant 0 : index
    %133 = vector.load %arg20[%c0_89, %c0_90] : memref<16x128xf32, #tpu.memory_space<vmem>>, vector<1x128xf32>
    %134 = vector.shape_cast %133 : vector<1x128xf32> to vector<1x128xf32>
    %135 = vector.broadcast %134 : vector<1x128xf32> to vector<8x128xf32>
    %136 = arith.mulf %132, %135 : vector<8x128xf32>
    %137 = arith.addf %1, %136 : vector<8x128xf32>
    %c1_91 = arith.constant 1 : index
    %c0_92 = arith.constant 0 : index
    %c0_93 = arith.constant 0 : index
    %138 = vector.load %arg4[%c1_91, %c0_92, %c0_93] : memref<4x8x128xf32, #tpu.memory_space<vmem>>, vector<1x8x128xf32>
    %139 = vector.shape_cast %138 : vector<1x8x128xf32> to vector<8x128xf32>
    %c1_94 = arith.constant 1 : index
    %c0_95 = arith.constant 0 : index
    %140 = vector.load %arg20[%c1_94, %c0_95] : memref<16x128xf32, #tpu.memory_space<vmem>>, vector<1x128xf32>
    %141 = vector.shape_cast %140 : vector<1x128xf32> to vector<1x128xf32>
    %142 = vector.broadcast %141 : vector<1x128xf32> to vector<8x128xf32>
    %143 = arith.mulf %139, %142 : vector<8x128xf32>
    %144 = arith.addf %130, %143 : vector<8x128xf32>
    %c2_96 = arith.constant 2 : index
    %c0_97 = arith.constant 0 : index
    %c0_98 = arith.constant 0 : index
    %145 = vector.load %arg4[%c2_96, %c0_97, %c0_98] : memref<4x8x128xf32, #tpu.memory_space<vmem>>, vector<1x8x128xf32>
    %146 = vector.shape_cast %145 : vector<1x8x128xf32> to vector<8x128xf32>
    %c2_99 = arith.constant 2 : index
    %c0_100 = arith.constant 0 : index
    %147 = vector.load %arg20[%c2_99, %c0_100] : memref<16x128xf32, #tpu.memory_space<vmem>>, vector<1x128xf32>
    %148 = vector.shape_cast %147 : vector<1x128xf32> to vector<1x128xf32>
    %149 = vector.broadcast %148 : vector<1x128xf32> to vector<8x128xf32>
    %150 = arith.mulf %146, %149 : vector<8x128xf32>
    %151 = arith.addf %137, %150 : vector<8x128xf32>
    %c3_101 = arith.constant 3 : index
    %c0_102 = arith.constant 0 : index
    %c0_103 = arith.constant 0 : index
    %152 = vector.load %arg4[%c3_101, %c0_102, %c0_103] : memref<4x8x128xf32, #tpu.memory_space<vmem>>, vector<1x8x128xf32>
    %153 = vector.shape_cast %152 : vector<1x8x128xf32> to vector<8x128xf32>
    %c3_104 = arith.constant 3 : index
    %c0_105 = arith.constant 0 : index
    %154 = vector.load %arg20[%c3_104, %c0_105] : memref<16x128xf32, #tpu.memory_space<vmem>>, vector<1x128xf32>
    %155 = vector.shape_cast %154 : vector<1x128xf32> to vector<1x128xf32>
    %156 = vector.broadcast %155 : vector<1x128xf32> to vector<8x128xf32>
    %157 = arith.mulf %153, %156 : vector<8x128xf32>
    %158 = arith.addf %144, %157 : vector<8x128xf32>
    %159 = arith.addf %151, %158 : vector<8x128xf32>
    %160 = math.tanh %159 : vector<8x128xf32>
    %c0_106 = arith.constant 0 : index
    %c0_107 = arith.constant 0 : index
    %161 = vector.load %arg19[%c0_106, %c0_107] : memref<16x128xf32, #tpu.memory_space<vmem>>, vector<8x128xf32>
    tpu.vector_store %arg19[%c0_106, %c0_107], %160 {strides = array<i32>} : memref<16x128xf32, #tpu.memory_space<vmem>>, vector<8x128xf32>,
    %cst_108 = arith.constant 0.000000e+00 : f32
    %162 = vector.broadcast %cst_108 : f32 to vector<8x128xf32>
    %c0_109 = arith.constant 0 : index
    %c0_110 = arith.constant 0 : index
    %c0_111 = arith.constant 0 : index
    %163 = vector.load %arg6[%c0_109, %c0_110, %c0_111] : memref<8x8x128xf32, #tpu.memory_space<vmem>>, vector<1x8x128xf32>
    %164 = vector.shape_cast %163 : vector<1x8x128xf32> to vector<8x128xf32>
    %c0_112 = arith.constant 0 : index
    %c0_113 = arith.constant 0 : index
    %165 = vector.load %arg19[%c0_112, %c0_113] : memref<16x128xf32, #tpu.memory_space<vmem>>, vector<1x128xf32>
    %166 = vector.shape_cast %165 : vector<1x128xf32> to vector<1x128xf32>
    %167 = vector.broadcast %166 : vector<1x128xf32> to vector<8x128xf32>
    %168 = arith.mulf %164, %167 : vector<8x128xf32>
    %169 = arith.addf %2, %168 : vector<8x128xf32>
    %c1_114 = arith.constant 1 : index
    %c0_115 = arith.constant 0 : index
    %c0_116 = arith.constant 0 : index
    %170 = vector.load %arg6[%c1_114, %c0_115, %c0_116] : memref<8x8x128xf32, #tpu.memory_space<vmem>>, vector<1x8x128xf32>
    %171 = vector.shape_cast %170 : vector<1x8x128xf32> to vector<8x128xf32>
    %c1_117 = arith.constant 1 : index
    %c0_118 = arith.constant 0 : index
    %172 = vector.load %arg19[%c1_117, %c0_118] : memref<16x128xf32, #tpu.memory_space<vmem>>, vector<1x128xf32>
    %173 = vector.shape_cast %172 : vector<1x128xf32> to vector<1x128xf32>
    %174 = vector.broadcast %173 : vector<1x128xf32> to vector<8x128xf32>
    %175 = arith.mulf %171, %174 : vector<8x128xf32>
    %176 = arith.addf %162, %175 : vector<8x128xf32>
    %c2_119 = arith.constant 2 : index
    %c0_120 = arith.constant 0 : index
    %c0_121 = arith.constant 0 : index
    %177 = vector.load %arg6[%c2_119, %c0_120, %c0_121] : memref<8x8x128xf32, #tpu.memory_space<vmem>>, vector<1x8x128xf32>
    %178 = vector.shape_cast %177 : vector<1x8x128xf32> to vector<8x128xf32>
    %c2_122 = arith.constant 2 : index
    %c0_123 = arith.constant 0 : index
    %179 = vector.load %arg19[%c2_122, %c0_123] : memref<16x128xf32, #tpu.memory_space<vmem>>, vector<1x128xf32>
    %180 = vector.shape_cast %179 : vector<1x128xf32> to vector<1x128xf32>
    %181 = vector.broadcast %180 : vector<1x128xf32> to vector<8x128xf32>
    %182 = arith.mulf %178, %181 : vector<8x128xf32>
    %183 = arith.addf %169, %182 : vector<8x128xf32>
    %c3_124 = arith.constant 3 : index
    %c0_125 = arith.constant 0 : index
    %c0_126 = arith.constant 0 : index
    %184 = vector.load %arg6[%c3_124, %c0_125, %c0_126] : memref<8x8x128xf32, #tpu.memory_space<vmem>>, vector<1x8x128xf32>
    %185 = vector.shape_cast %184 : vector<1x8x128xf32> to vector<8x128xf32>
    %c3_127 = arith.constant 3 : index
    %c0_128 = arith.constant 0 : index
    %186 = vector.load %arg19[%c3_127, %c0_128] : memref<16x128xf32, #tpu.memory_space<vmem>>, vector<1x128xf32>
    %187 = vector.shape_cast %186 : vector<1x128xf32> to vector<1x128xf32>
    %188 = vector.broadcast %187 : vector<1x128xf32> to vector<8x128xf32>
    %189 = arith.mulf %185, %188 : vector<8x128xf32>
    %190 = arith.addf %176, %189 : vector<8x128xf32>
    %c4_129 = arith.constant 4 : index
    %c0_130 = arith.constant 0 : index
    %c0_131 = arith.constant 0 : index
    %191 = vector.load %arg6[%c4_129, %c0_130, %c0_131] : memref<8x8x128xf32, #tpu.memory_space<vmem>>, vector<1x8x128xf32>
    %192 = vector.shape_cast %191 : vector<1x8x128xf32> to vector<8x128xf32>
    %c4_132 = arith.constant 4 : index
    %c0_133 = arith.constant 0 : index
    %193 = vector.load %arg19[%c4_132, %c0_133] : memref<16x128xf32, #tpu.memory_space<vmem>>, vector<1x128xf32>
    %194 = vector.shape_cast %193 : vector<1x128xf32> to vector<1x128xf32>
    %195 = vector.broadcast %194 : vector<1x128xf32> to vector<8x128xf32>
    %196 = arith.mulf %192, %195 : vector<8x128xf32>
    %197 = arith.addf %183, %196 : vector<8x128xf32>
    %c5_134 = arith.constant 5 : index
    %c0_135 = arith.constant 0 : index
    %c0_136 = arith.constant 0 : index
    %198 = vector.load %arg6[%c5_134, %c0_135, %c0_136] : memref<8x8x128xf32, #tpu.memory_space<vmem>>, vector<1x8x128xf32>
    %199 = vector.shape_cast %198 : vector<1x8x128xf32> to vector<8x128xf32>
    %c5_137 = arith.constant 5 : index
    %c0_138 = arith.constant 0 : index
    %200 = vector.load %arg19[%c5_137, %c0_138] : memref<16x128xf32, #tpu.memory_space<vmem>>, vector<1x128xf32>
    %201 = vector.shape_cast %200 : vector<1x128xf32> to vector<1x128xf32>
    %202 = vector.broadcast %201 : vector<1x128xf32> to vector<8x128xf32>
    %203 = arith.mulf %199, %202 : vector<8x128xf32>
    %204 = arith.addf %190, %203 : vector<8x128xf32>
    %c6_139 = arith.constant 6 : index
    %c0_140 = arith.constant 0 : index
    %c0_141 = arith.constant 0 : index
    %205 = vector.load %arg6[%c6_139, %c0_140, %c0_141] : memref<8x8x128xf32, #tpu.memory_space<vmem>>, vector<1x8x128xf32>
    %206 = vector.shape_cast %205 : vector<1x8x128xf32> to vector<8x128xf32>
    %c6_142 = arith.constant 6 : index
    %c0_143 = arith.constant 0 : index
    %207 = vector.load %arg19[%c6_142, %c0_143] : memref<16x128xf32, #tpu.memory_space<vmem>>, vector<1x128xf32>
    %208 = vector.shape_cast %207 : vector<1x128xf32> to vector<1x128xf32>
    %209 = vector.broadcast %208 : vector<1x128xf32> to vector<8x128xf32>
    %210 = arith.mulf %206, %209 : vector<8x128xf32>
    %211 = arith.addf %197, %210 : vector<8x128xf32>
    %c7_144 = arith.constant 7 : index
    %c0_145 = arith.constant 0 : index
    %c0_146 = arith.constant 0 : index
    %212 = vector.load %arg6[%c7_144, %c0_145, %c0_146] : memref<8x8x128xf32, #tpu.memory_space<vmem>>, vector<1x8x128xf32>
    %213 = vector.shape_cast %212 : vector<1x8x128xf32> to vector<8x128xf32>
    %c7_147 = arith.constant 7 : index
    %c0_148 = arith.constant 0 : index
    %214 = vector.load %arg19[%c7_147, %c0_148] : memref<16x128xf32, #tpu.memory_space<vmem>>, vector<1x128xf32>
    %215 = vector.shape_cast %214 : vector<1x128xf32> to vector<1x128xf32>
    %216 = vector.broadcast %215 : vector<1x128xf32> to vector<8x128xf32>
    %217 = arith.mulf %213, %216 : vector<8x128xf32>
    %218 = arith.addf %204, %217 : vector<8x128xf32>
    %219 = arith.addf %211, %218 : vector<8x128xf32>
    %220 = math.tanh %219 : vector<8x128xf32>
    %c0_149 = arith.constant 0 : index
    %c0_150 = arith.constant 0 : index
    %221 = vector.load %arg20[%c0_149, %c0_150] : memref<16x128xf32, #tpu.memory_space<vmem>>, vector<8x128xf32>
    tpu.vector_store %arg20[%c0_149, %c0_150], %220 {strides = array<i32>} : memref<16x128xf32, #tpu.memory_space<vmem>>, vector<8x128xf32>,
    %cst_151 = arith.constant 0.000000e+00 : f32
    %222 = vector.broadcast %cst_151 : f32 to vector<8x128xf32>
    %c0_152 = arith.constant 0 : index
    %c0_153 = arith.constant 0 : index
    %c0_154 = arith.constant 0 : index
    %223 = vector.load %arg8[%c0_152, %c0_153, %c0_154] : memref<5x8x128xf32, #tpu.memory_space<vmem>>, vector<1x8x128xf32>
    %224 = vector.shape_cast %223 : vector<1x8x128xf32> to vector<8x128xf32>
    %c0_155 = arith.constant 0 : index
    %c0_156 = arith.constant 0 : index
    %225 = vector.load %arg20[%c0_155, %c0_156] : memref<16x128xf32, #tpu.memory_space<vmem>>, vector<1x128xf32>
    %226 = vector.shape_cast %225 : vector<1x128xf32> to vector<1x128xf32>
    %227 = vector.broadcast %226 : vector<1x128xf32> to vector<8x128xf32>
    %228 = arith.mulf %224, %227 : vector<8x128xf32>
    %229 = arith.addf %3, %228 : vector<8x128xf32>
    %c1_157 = arith.constant 1 : index
    %c0_158 = arith.constant 0 : index
    %c0_159 = arith.constant 0 : index
    %230 = vector.load %arg8[%c1_157, %c0_158, %c0_159] : memref<5x8x128xf32, #tpu.memory_space<vmem>>, vector<1x8x128xf32>
    %231 = vector.shape_cast %230 : vector<1x8x128xf32> to vector<8x128xf32>
    %c1_160 = arith.constant 1 : index
    %c0_161 = arith.constant 0 : index
    %232 = vector.load %arg20[%c1_160, %c0_161] : memref<16x128xf32, #tpu.memory_space<vmem>>, vector<1x128xf32>
    %233 = vector.shape_cast %232 : vector<1x128xf32> to vector<1x128xf32>
    %234 = vector.broadcast %233 : vector<1x128xf32> to vector<8x128xf32>
    %235 = arith.mulf %231, %234 : vector<8x128xf32>
    %236 = arith.addf %222, %235 : vector<8x128xf32>
    %c2_162 = arith.constant 2 : index
    %c0_163 = arith.constant 0 : index
    %c0_164 = arith.constant 0 : index
    %237 = vector.load %arg8[%c2_162, %c0_163, %c0_164] : memref<5x8x128xf32, #tpu.memory_space<vmem>>, vector<1x8x128xf32>
    %238 = vector.shape_cast %237 : vector<1x8x128xf32> to vector<8x128xf32>
    %c2_165 = arith.constant 2 : index
    %c0_166 = arith.constant 0 : index
    %239 = vector.load %arg20[%c2_165, %c0_166] : memref<16x128xf32, #tpu.memory_space<vmem>>, vector<1x128xf32>
    %240 = vector.shape_cast %239 : vector<1x128xf32> to vector<1x128xf32>
    %241 = vector.broadcast %240 : vector<1x128xf32> to vector<8x128xf32>
    %242 = arith.mulf %238, %241 : vector<8x128xf32>
    %243 = arith.addf %229, %242 : vector<8x128xf32>
    %c3_167 = arith.constant 3 : index
    %c0_168 = arith.constant 0 : index
    %c0_169 = arith.constant 0 : index
    %244 = vector.load %arg8[%c3_167, %c0_168, %c0_169] : memref<5x8x128xf32, #tpu.memory_space<vmem>>, vector<1x8x128xf32>
    %245 = vector.shape_cast %244 : vector<1x8x128xf32> to vector<8x128xf32>
    %c3_170 = arith.constant 3 : index
    %c0_171 = arith.constant 0 : index
    %246 = vector.load %arg20[%c3_170, %c0_171] : memref<16x128xf32, #tpu.memory_space<vmem>>, vector<1x128xf32>
    %247 = vector.shape_cast %246 : vector<1x128xf32> to vector<1x128xf32>
    %248 = vector.broadcast %247 : vector<1x128xf32> to vector<8x128xf32>
    %249 = arith.mulf %245, %248 : vector<8x128xf32>
    %250 = arith.addf %236, %249 : vector<8x128xf32>
    %c4_172 = arith.constant 4 : index
    %c0_173 = arith.constant 0 : index
    %c0_174 = arith.constant 0 : index
    %251 = vector.load %arg8[%c4_172, %c0_173, %c0_174] : memref<5x8x128xf32, #tpu.memory_space<vmem>>, vector<1x8x128xf32>
    %252 = vector.shape_cast %251 : vector<1x8x128xf32> to vector<8x128xf32>
    %c4_175 = arith.constant 4 : index
    %c0_176 = arith.constant 0 : index
    %253 = vector.load %arg20[%c4_175, %c0_176] : memref<16x128xf32, #tpu.memory_space<vmem>>, vector<1x128xf32>
    %254 = vector.shape_cast %253 : vector<1x128xf32> to vector<1x128xf32>
    %255 = vector.broadcast %254 : vector<1x128xf32> to vector<8x128xf32>
    %256 = arith.mulf %252, %255 : vector<8x128xf32>
    %257 = arith.addf %243, %256 : vector<8x128xf32>
    %258 = arith.addf %257, %250 : vector<8x128xf32>
    %259 = math.tanh %258 : vector<8x128xf32>
    %c0_177 = arith.constant 0 : index
    %c0_178 = arith.constant 0 : index
    %260 = vector.load %arg19[%c0_177, %c0_178] : memref<16x128xf32, #tpu.memory_space<vmem>>, vector<8x128xf32>
    tpu.vector_store %arg19[%c0_177, %c0_178], %259 {strides = array<i32>} : memref<16x128xf32, #tpu.memory_space<vmem>>, vector<8x128xf32>,
    %cst_179 = arith.constant 0.000000e+00 : f32
    %261 = vector.broadcast %cst_179 : f32 to vector<8x128xf32>
    %c0_180 = arith.constant 0 : index
    %c0_181 = arith.constant 0 : index
    %c0_182 = arith.constant 0 : index
    %262 = vector.load %arg10[%c0_180, %c0_181, %c0_182] : memref<3x8x128xf32, #tpu.memory_space<vmem>>, vector<1x8x128xf32>
    %263 = vector.shape_cast %262 : vector<1x8x128xf32> to vector<8x128xf32>
    %c0_183 = arith.constant 0 : index
    %c0_184 = arith.constant 0 : index
    %264 = vector.load %arg19[%c0_183, %c0_184] : memref<16x128xf32, #tpu.memory_space<vmem>>, vector<1x128xf32>
    %265 = vector.shape_cast %264 : vector<1x128xf32> to vector<1x128xf32>
    %266 = vector.broadcast %265 : vector<1x128xf32> to vector<8x128xf32>
    %267 = arith.mulf %263, %266 : vector<8x128xf32>
    %268 = arith.addf %4, %267 : vector<8x128xf32>
    %c1_185 = arith.constant 1 : index
    %c0_186 = arith.constant 0 : index
    %c0_187 = arith.constant 0 : index
    %269 = vector.load %arg10[%c1_185, %c0_186, %c0_187] : memref<3x8x128xf32, #tpu.memory_space<vmem>>, vector<1x8x128xf32>
    %270 = vector.shape_cast %269 : vector<1x8x128xf32> to vector<8x128xf32>
    %c1_188 = arith.constant 1 : index
    %c0_189 = arith.constant 0 : index
    %271 = vector.load %arg19[%c1_188, %c0_189] : memref<16x128xf32, #tpu.memory_space<vmem>>, vector<1x128xf32>
    %272 = vector.shape_cast %271 : vector<1x128xf32> to vector<1x128xf32>
    %273 = vector.broadcast %272 : vector<1x128xf32> to vector<8x128xf32>
    %274 = arith.mulf %270, %273 : vector<8x128xf32>
    %275 = arith.addf %261, %274 : vector<8x128xf32>
    %c2_190 = arith.constant 2 : index
    %c0_191 = arith.constant 0 : index
    %c0_192 = arith.constant 0 : index
    %276 = vector.load %arg10[%c2_190, %c0_191, %c0_192] : memref<3x8x128xf32, #tpu.memory_space<vmem>>, vector<1x8x128xf32>
    %277 = vector.shape_cast %276 : vector<1x8x128xf32> to vector<8x128xf32>
    %c2_193 = arith.constant 2 : index
    %c0_194 = arith.constant 0 : index
    %278 = vector.load %arg19[%c2_193, %c0_194] : memref<16x128xf32, #tpu.memory_space<vmem>>, vector<1x128xf32>
    %279 = vector.shape_cast %278 : vector<1x128xf32> to vector<1x128xf32>
    %280 = vector.broadcast %279 : vector<1x128xf32> to vector<8x128xf32>
    %281 = arith.mulf %277, %280 : vector<8x128xf32>
    %282 = arith.addf %268, %281 : vector<8x128xf32>
    %283 = arith.addf %282, %275 : vector<8x128xf32>
    %284 = math.tanh %283 : vector<8x128xf32>
    %c0_195 = arith.constant 0 : index
    %c0_196 = arith.constant 0 : index
    %285 = vector.load %arg20[%c0_195, %c0_196] : memref<16x128xf32, #tpu.memory_space<vmem>>, vector<8x128xf32>
    tpu.vector_store %arg20[%c0_195, %c0_196], %284 {strides = array<i32>} : memref<16x128xf32, #tpu.memory_space<vmem>>, vector<8x128xf32>,
    %cst_197 = arith.constant 0.000000e+00 : f32
    %286 = vector.broadcast %cst_197 : f32 to vector<16x128xf32>
    %c0_198 = arith.constant 0 : index
    %c0_199 = arith.constant 0 : index
    %c0_200 = arith.constant 0 : index
    %287 = vector.load %arg12[%c0_198, %c0_199, %c0_200] : memref<6x16x128xf32, #tpu.memory_space<vmem>>, vector<1x16x128xf32>
    %288 = vector.shape_cast %287 : vector<1x16x128xf32> to vector<16x128xf32>
    %c0_201 = arith.constant 0 : index
    %c0_202 = arith.constant 0 : index
    %289 = vector.load %arg20[%c0_201, %c0_202] : memref<16x128xf32, #tpu.memory_space<vmem>>, vector<1x128xf32>
    %290 = vector.shape_cast %289 : vector<1x128xf32> to vector<1x128xf32>
    %291 = vector.broadcast %290 : vector<1x128xf32> to vector<16x128xf32>
    %292 = arith.mulf %288, %291 : vector<16x128xf32>
    %293 = arith.addf %5, %292 : vector<16x128xf32>
    %c1_203 = arith.constant 1 : index
    %c0_204 = arith.constant 0 : index
    %c0_205 = arith.constant 0 : index
    %294 = vector.load %arg12[%c1_203, %c0_204, %c0_205] : memref<6x16x128xf32, #tpu.memory_space<vmem>>, vector<1x16x128xf32>
    %295 = vector.shape_cast %294 : vector<1x16x128xf32> to vector<16x128xf32>
    %c1_206 = arith.constant 1 : index
    %c0_207 = arith.constant 0 : index
    %296 = vector.load %arg20[%c1_206, %c0_207] : memref<16x128xf32, #tpu.memory_space<vmem>>, vector<1x128xf32>
    %297 = vector.shape_cast %296 : vector<1x128xf32> to vector<1x128xf32>
    %298 = vector.broadcast %297 : vector<1x128xf32> to vector<16x128xf32>
    %299 = arith.mulf %295, %298 : vector<16x128xf32>
    %300 = arith.addf %286, %299 : vector<16x128xf32>
    %c2_208 = arith.constant 2 : index
    %c0_209 = arith.constant 0 : index
    %c0_210 = arith.constant 0 : index
    %301 = vector.load %arg12[%c2_208, %c0_209, %c0_210] : memref<6x16x128xf32, #tpu.memory_space<vmem>>, vector<1x16x128xf32>
    %302 = vector.shape_cast %301 : vector<1x16x128xf32> to vector<16x128xf32>
    %c2_211 = arith.constant 2 : index
    %c0_212 = arith.constant 0 : index
    %303 = vector.load %arg20[%c2_211, %c0_212] : memref<16x128xf32, #tpu.memory_space<vmem>>, vector<1x128xf32>
    %304 = vector.shape_cast %303 : vector<1x128xf32> to vector<1x128xf32>
    %305 = vector.broadcast %304 : vector<1x128xf32> to vector<16x128xf32>
    %306 = arith.mulf %302, %305 : vector<16x128xf32>
    %307 = arith.addf %293, %306 : vector<16x128xf32>
    %c3_213 = arith.constant 3 : index
    %c0_214 = arith.constant 0 : index
    %c0_215 = arith.constant 0 : index
    %308 = vector.load %arg12[%c3_213, %c0_214, %c0_215] : memref<6x16x128xf32, #tpu.memory_space<vmem>>, vector<1x16x128xf32>
    %309 = vector.shape_cast %308 : vector<1x16x128xf32> to vector<16x128xf32>
    %c3_216 = arith.constant 3 : index
    %c0_217 = arith.constant 0 : index
    %310 = vector.load %arg20[%c3_216, %c0_217] : memref<16x128xf32, #tpu.memory_space<vmem>>, vector<1x128xf32>
    %311 = vector.shape_cast %310 : vector<1x128xf32> to vector<1x128xf32>
    %312 = vector.broadcast %311 : vector<1x128xf32> to vector<16x128xf32>
    %313 = arith.mulf %309, %312 : vector<16x128xf32>
    %314 = arith.addf %300, %313 : vector<16x128xf32>
    %c4_218 = arith.constant 4 : index
    %c0_219 = arith.constant 0 : index
    %c0_220 = arith.constant 0 : index
    %315 = vector.load %arg12[%c4_218, %c0_219, %c0_220] : memref<6x16x128xf32, #tpu.memory_space<vmem>>, vector<1x16x128xf32>
    %316 = vector.shape_cast %315 : vector<1x16x128xf32> to vector<16x128xf32>
    %c4_221 = arith.constant 4 : index
    %c0_222 = arith.constant 0 : index
    %317 = vector.load %arg20[%c4_221, %c0_222] : memref<16x128xf32, #tpu.memory_space<vmem>>, vector<1x128xf32>
    %318 = vector.shape_cast %317 : vector<1x128xf32> to vector<1x128xf32>
    %319 = vector.broadcast %318 : vector<1x128xf32> to vector<16x128xf32>
    %320 = arith.mulf %316, %319 : vector<16x128xf32>
    %321 = arith.addf %307, %320 : vector<16x128xf32>
    %c5_223 = arith.constant 5 : index
    %c0_224 = arith.constant 0 : index
    %c0_225 = arith.constant 0 : index
    %322 = vector.load %arg12[%c5_223, %c0_224, %c0_225] : memref<6x16x128xf32, #tpu.memory_space<vmem>>, vector<1x16x128xf32>
    %323 = vector.shape_cast %322 : vector<1x16x128xf32> to vector<16x128xf32>
    %c5_226 = arith.constant 5 : index
    %c0_227 = arith.constant 0 : index
    %324 = vector.load %arg20[%c5_226, %c0_227] : memref<16x128xf32, #tpu.memory_space<vmem>>, vector<1x128xf32>
    %325 = vector.shape_cast %324 : vector<1x128xf32> to vector<1x128xf32>
    %326 = vector.broadcast %325 : vector<1x128xf32> to vector<16x128xf32>
    %327 = arith.mulf %323, %326 : vector<16x128xf32>
    %328 = arith.addf %314, %327 : vector<16x128xf32>
    %329 = arith.addf %321, %328 : vector<16x128xf32>
    %330 = math.tanh %329 : vector<16x128xf32>
    %c0_228 = arith.constant 0 : index
    %c0_229 = arith.constant 0 : index
    %331 = vector.load %arg19[%c0_228, %c0_229] : memref<16x128xf32, #tpu.memory_space<vmem>>, vector<16x128xf32>
    tpu.vector_store %arg19[%c0_228, %c0_229], %330 {strides = array<i32>} : memref<16x128xf32, #tpu.memory_space<vmem>>, vector<16x128xf32>,
    %cst_230 = arith.constant 0.000000e+00 : f32
    %332 = vector.broadcast %cst_230 : f32 to vector<8x128xf32>
    %c0_231 = arith.constant 0 : index
    %c0_232 = arith.constant 0 : index
    %c0_233 = arith.constant 0 : index
    %333 = vector.load %arg14[%c0_231, %c0_232, %c0_233] : memref<10x8x128xf32, #tpu.memory_space<vmem>>, vector<1x8x128xf32>
    %334 = vector.shape_cast %333 : vector<1x8x128xf32> to vector<8x128xf32>
    %c0_234 = arith.constant 0 : index
    %c0_235 = arith.constant 0 : index
    %335 = vector.load %arg19[%c0_234, %c0_235] : memref<16x128xf32, #tpu.memory_space<vmem>>, vector<1x128xf32>
    %336 = vector.shape_cast %335 : vector<1x128xf32> to vector<1x128xf32>
    %337 = vector.broadcast %336 : vector<1x128xf32> to vector<8x128xf32>
    %338 = arith.mulf %334, %337 : vector<8x128xf32>
    %339 = arith.addf %6, %338 : vector<8x128xf32>
    %c1_236 = arith.constant 1 : index
    %c0_237 = arith.constant 0 : index
    %c0_238 = arith.constant 0 : index
    %340 = vector.load %arg14[%c1_236, %c0_237, %c0_238] : memref<10x8x128xf32, #tpu.memory_space<vmem>>, vector<1x8x128xf32>
    %341 = vector.shape_cast %340 : vector<1x8x128xf32> to vector<8x128xf32>
    %c1_239 = arith.constant 1 : index
    %c0_240 = arith.constant 0 : index
    %342 = vector.load %arg19[%c1_239, %c0_240] : memref<16x128xf32, #tpu.memory_space<vmem>>, vector<1x128xf32>
    %343 = vector.shape_cast %342 : vector<1x128xf32> to vector<1x128xf32>
    %344 = vector.broadcast %343 : vector<1x128xf32> to vector<8x128xf32>
    %345 = arith.mulf %341, %344 : vector<8x128xf32>
    %346 = arith.addf %332, %345 : vector<8x128xf32>
    %c2_241 = arith.constant 2 : index
    %c0_242 = arith.constant 0 : index
    %c0_243 = arith.constant 0 : index
    %347 = vector.load %arg14[%c2_241, %c0_242, %c0_243] : memref<10x8x128xf32, #tpu.memory_space<vmem>>, vector<1x8x128xf32>
    %348 = vector.shape_cast %347 : vector<1x8x128xf32> to vector<8x128xf32>
    %c2_244 = arith.constant 2 : index
    %c0_245 = arith.constant 0 : index
    %349 = vector.load %arg19[%c2_244, %c0_245] : memref<16x128xf32, #tpu.memory_space<vmem>>, vector<1x128xf32>
    %350 = vector.shape_cast %349 : vector<1x128xf32> to vector<1x128xf32>
    %351 = vector.broadcast %350 : vector<1x128xf32> to vector<8x128xf32>
    %352 = arith.mulf %348, %351 : vector<8x128xf32>
    %353 = arith.addf %339, %352 : vector<8x128xf32>
    %c3_246 = arith.constant 3 : index
    %c0_247 = arith.constant 0 : index
    %c0_248 = arith.constant 0 : index
    %354 = vector.load %arg14[%c3_246, %c0_247, %c0_248] : memref<10x8x128xf32, #tpu.memory_space<vmem>>, vector<1x8x128xf32>
    %355 = vector.shape_cast %354 : vector<1x8x128xf32> to vector<8x128xf32>
    %c3_249 = arith.constant 3 : index
    %c0_250 = arith.constant 0 : index
    %356 = vector.load %arg19[%c3_249, %c0_250] : memref<16x128xf32, #tpu.memory_space<vmem>>, vector<1x128xf32>
    %357 = vector.shape_cast %356 : vector<1x128xf32> to vector<1x128xf32>
    %358 = vector.broadcast %357 : vector<1x128xf32> to vector<8x128xf32>
    %359 = arith.mulf %355, %358 : vector<8x128xf32>
    %360 = arith.addf %346, %359 : vector<8x128xf32>
    %c4_251 = arith.constant 4 : index
    %c0_252 = arith.constant 0 : index
    %c0_253 = arith.constant 0 : index
    %361 = vector.load %arg14[%c4_251, %c0_252, %c0_253] : memref<10x8x128xf32, #tpu.memory_space<vmem>>, vector<1x8x128xf32>
    %362 = vector.shape_cast %361 : vector<1x8x128xf32> to vector<8x128xf32>
    %c4_254 = arith.constant 4 : index
    %c0_255 = arith.constant 0 : index
    %363 = vector.load %arg19[%c4_254, %c0_255] : memref<16x128xf32, #tpu.memory_space<vmem>>, vector<1x128xf32>
    %364 = vector.shape_cast %363 : vector<1x128xf32> to vector<1x128xf32>
    %365 = vector.broadcast %364 : vector<1x128xf32> to vector<8x128xf32>
    %366 = arith.mulf %362, %365 : vector<8x128xf32>
    %367 = arith.addf %353, %366 : vector<8x128xf32>
    %c5_256 = arith.constant 5 : index
    %c0_257 = arith.constant 0 : index
    %c0_258 = arith.constant 0 : index
    %368 = vector.load %arg14[%c5_256, %c0_257, %c0_258] : memref<10x8x128xf32, #tpu.memory_space<vmem>>, vector<1x8x128xf32>
    %369 = vector.shape_cast %368 : vector<1x8x128xf32> to vector<8x128xf32>
    %c5_259 = arith.constant 5 : index
    %c0_260 = arith.constant 0 : index
    %370 = vector.load %arg19[%c5_259, %c0_260] : memref<16x128xf32, #tpu.memory_space<vmem>>, vector<1x128xf32>
    %371 = vector.shape_cast %370 : vector<1x128xf32> to vector<1x128xf32>
    %372 = vector.broadcast %371 : vector<1x128xf32> to vector<8x128xf32>
    %373 = arith.mulf %369, %372 : vector<8x128xf32>
    %374 = arith.addf %360, %373 : vector<8x128xf32>
    %c6_261 = arith.constant 6 : index
    %c0_262 = arith.constant 0 : index
    %c0_263 = arith.constant 0 : index
    %375 = vector.load %arg14[%c6_261, %c0_262, %c0_263] : memref<10x8x128xf32, #tpu.memory_space<vmem>>, vector<1x8x128xf32>
    %376 = vector.shape_cast %375 : vector<1x8x128xf32> to vector<8x128xf32>
    %c6_264 = arith.constant 6 : index
    %c0_265 = arith.constant 0 : index
    %377 = vector.load %arg19[%c6_264, %c0_265] : memref<16x128xf32, #tpu.memory_space<vmem>>, vector<1x128xf32>
    %378 = vector.shape_cast %377 : vector<1x128xf32> to vector<1x128xf32>
    %379 = vector.broadcast %378 : vector<1x128xf32> to vector<8x128xf32>
    %380 = arith.mulf %376, %379 : vector<8x128xf32>
    %381 = arith.addf %367, %380 : vector<8x128xf32>
    %c7_266 = arith.constant 7 : index
    %c0_267 = arith.constant 0 : index
    %c0_268 = arith.constant 0 : index
    %382 = vector.load %arg14[%c7_266, %c0_267, %c0_268] : memref<10x8x128xf32, #tpu.memory_space<vmem>>, vector<1x8x128xf32>
    %383 = vector.shape_cast %382 : vector<1x8x128xf32> to vector<8x128xf32>
    %c7_269 = arith.constant 7 : index
    %c0_270 = arith.constant 0 : index
    %384 = vector.load %arg19[%c7_269, %c0_270] : memref<16x128xf32, #tpu.memory_space<vmem>>, vector<1x128xf32>
    %385 = vector.shape_cast %384 : vector<1x128xf32> to vector<1x128xf32>
    %386 = vector.broadcast %385 : vector<1x128xf32> to vector<8x128xf32>
    %387 = arith.mulf %383, %386 : vector<8x128xf32>
    %388 = arith.addf %374, %387 : vector<8x128xf32>
    %c8_271 = arith.constant 8 : index
    %c0_272 = arith.constant 0 : index
    %c0_273 = arith.constant 0 : index
    %389 = vector.load %arg14[%c8_271, %c0_272, %c0_273] : memref<10x8x128xf32, #tpu.memory_space<vmem>>, vector<1x8x128xf32>
    %390 = vector.shape_cast %389 : vector<1x8x128xf32> to vector<8x128xf32>
    %c8_274 = arith.constant 8 : index
    %c0_275 = arith.constant 0 : index
    %391 = vector.load %arg19[%c8_274, %c0_275] : memref<16x128xf32, #tpu.memory_space<vmem>>, vector<1x128xf32>
    %392 = vector.shape_cast %391 : vector<1x128xf32> to vector<1x128xf32>
    %393 = vector.broadcast %392 : vector<1x128xf32> to vector<8x128xf32>
    %394 = arith.mulf %390, %393 : vector<8x128xf32>
    %395 = arith.addf %381, %394 : vector<8x128xf32>
    %c9_276 = arith.constant 9 : index
    %c0_277 = arith.constant 0 : index
    %c0_278 = arith.constant 0 : index
    %396 = vector.load %arg14[%c9_276, %c0_277, %c0_278] : memref<10x8x128xf32, #tpu.memory_space<vmem>>, vector<1x8x128xf32>
    %397 = vector.shape_cast %396 : vector<1x8x128xf32> to vector<8x128xf32>
    %c9_279 = arith.constant 9 : index
    %c0_280 = arith.constant 0 : index
    %398 = vector.load %arg19[%c9_279, %c0_280] : memref<16x128xf32, #tpu.memory_space<vmem>>, vector<1x128xf32>
    %399 = vector.shape_cast %398 : vector<1x128xf32> to vector<1x128xf32>
    %400 = vector.broadcast %399 : vector<1x128xf32> to vector<8x128xf32>
    %401 = arith.mulf %397, %400 : vector<8x128xf32>
    %402 = arith.addf %388, %401 : vector<8x128xf32>
    %403 = arith.addf %395, %402 : vector<8x128xf32>
    %404 = math.tanh %403 : vector<8x128xf32>
    %c0_281 = arith.constant 0 : index
    %c0_282 = arith.constant 0 : index
    %405 = vector.load %arg20[%c0_281, %c0_282] : memref<16x128xf32, #tpu.memory_space<vmem>>, vector<8x128xf32>
    tpu.vector_store %arg20[%c0_281, %c0_282], %404 {strides = array<i32>} : memref<16x128xf32, #tpu.memory_space<vmem>>, vector<8x128xf32>,
    %cst_283 = arith.constant 0.000000e+00 : f32
    %406 = vector.broadcast %cst_283 : f32 to vector<16x128xf32>
    %c0_284 = arith.constant 0 : index
    %c0_285 = arith.constant 0 : index
    %c0_286 = arith.constant 0 : index
    %407 = vector.load %arg16[%c0_284, %c0_285, %c0_286] : memref<8x16x128xf32, #tpu.memory_space<vmem>>, vector<1x16x128xf32>
    %408 = vector.shape_cast %407 : vector<1x16x128xf32> to vector<16x128xf32>
    %c0_287 = arith.constant 0 : index
    %c0_288 = arith.constant 0 : index
    %409 = vector.load %arg20[%c0_287, %c0_288] : memref<16x128xf32, #tpu.memory_space<vmem>>, vector<1x128xf32>
    %410 = vector.shape_cast %409 : vector<1x128xf32> to vector<1x128xf32>
    %411 = vector.broadcast %410 : vector<1x128xf32> to vector<16x128xf32>
    %412 = arith.mulf %408, %411 : vector<16x128xf32>
    %413 = arith.addf %7, %412 : vector<16x128xf32>
    %c1_289 = arith.constant 1 : index
    %c0_290 = arith.constant 0 : index
    %c0_291 = arith.constant 0 : index
    %414 = vector.load %arg16[%c1_289, %c0_290, %c0_291] : memref<8x16x128xf32, #tpu.memory_space<vmem>>, vector<1x16x128xf32>
    %415 = vector.shape_cast %414 : vector<1x16x128xf32> to vector<16x128xf32>
    %c1_292 = arith.constant 1 : index
    %c0_293 = arith.constant 0 : index
    %416 = vector.load %arg20[%c1_292, %c0_293] : memref<16x128xf32, #tpu.memory_space<vmem>>, vector<1x128xf32>
    %417 = vector.shape_cast %416 : vector<1x128xf32> to vector<1x128xf32>
    %418 = vector.broadcast %417 : vector<1x128xf32> to vector<16x128xf32>
    %419 = arith.mulf %415, %418 : vector<16x128xf32>
    %420 = arith.addf %406, %419 : vector<16x128xf32>
    %c2_294 = arith.constant 2 : index
    %c0_295 = arith.constant 0 : index
    %c0_296 = arith.constant 0 : index
    %421 = vector.load %arg16[%c2_294, %c0_295, %c0_296] : memref<8x16x128xf32, #tpu.memory_space<vmem>>, vector<1x16x128xf32>
    %422 = vector.shape_cast %421 : vector<1x16x128xf32> to vector<16x128xf32>
    %c2_297 = arith.constant 2 : index
    %c0_298 = arith.constant 0 : index
    %423 = vector.load %arg20[%c2_297, %c0_298] : memref<16x128xf32, #tpu.memory_space<vmem>>, vector<1x128xf32>
    %424 = vector.shape_cast %423 : vector<1x128xf32> to vector<1x128xf32>
    %425 = vector.broadcast %424 : vector<1x128xf32> to vector<16x128xf32>
    %426 = arith.mulf %422, %425 : vector<16x128xf32>
    %427 = arith.addf %413, %426 : vector<16x128xf32>
    %c3_299 = arith.constant 3 : index
    %c0_300 = arith.constant 0 : index
    %c0_301 = arith.constant 0 : index
    %428 = vector.load %arg16[%c3_299, %c0_300, %c0_301] : memref<8x16x128xf32, #tpu.memory_space<vmem>>, vector<1x16x128xf32>
    %429 = vector.shape_cast %428 : vector<1x16x128xf32> to vector<16x128xf32>
    %c3_302 = arith.constant 3 : index
    %c0_303 = arith.constant 0 : index
    %430 = vector.load %arg20[%c3_302, %c0_303] : memref<16x128xf32, #tpu.memory_space<vmem>>, vector<1x128xf32>
    %431 = vector.shape_cast %430 : vector<1x128xf32> to vector<1x128xf32>
    %432 = vector.broadcast %431 : vector<1x128xf32> to vector<16x128xf32>
    %433 = arith.mulf %429, %432 : vector<16x128xf32>
    %434 = arith.addf %420, %433 : vector<16x128xf32>
    %c4_304 = arith.constant 4 : index
    %c0_305 = arith.constant 0 : index
    %c0_306 = arith.constant 0 : index
    %435 = vector.load %arg16[%c4_304, %c0_305, %c0_306] : memref<8x16x128xf32, #tpu.memory_space<vmem>>, vector<1x16x128xf32>
    %436 = vector.shape_cast %435 : vector<1x16x128xf32> to vector<16x128xf32>
    %c4_307 = arith.constant 4 : index
    %c0_308 = arith.constant 0 : index
    %437 = vector.load %arg20[%c4_307, %c0_308] : memref<16x128xf32, #tpu.memory_space<vmem>>, vector<1x128xf32>
    %438 = vector.shape_cast %437 : vector<1x128xf32> to vector<1x128xf32>
    %439 = vector.broadcast %438 : vector<1x128xf32> to vector<16x128xf32>
    %440 = arith.mulf %436, %439 : vector<16x128xf32>
    %441 = arith.addf %427, %440 : vector<16x128xf32>
    %c5_309 = arith.constant 5 : index
    %c0_310 = arith.constant 0 : index
    %c0_311 = arith.constant 0 : index
    %442 = vector.load %arg16[%c5_309, %c0_310, %c0_311] : memref<8x16x128xf32, #tpu.memory_space<vmem>>, vector<1x16x128xf32>
    %443 = vector.shape_cast %442 : vector<1x16x128xf32> to vector<16x128xf32>
    %c5_312 = arith.constant 5 : index
    %c0_313 = arith.constant 0 : index
    %444 = vector.load %arg20[%c5_312, %c0_313] : memref<16x128xf32, #tpu.memory_space<vmem>>, vector<1x128xf32>
    %445 = vector.shape_cast %444 : vector<1x128xf32> to vector<1x128xf32>
    %446 = vector.broadcast %445 : vector<1x128xf32> to vector<16x128xf32>
    %447 = arith.mulf %443, %446 : vector<16x128xf32>
    %448 = arith.addf %434, %447 : vector<16x128xf32>
    %c6_314 = arith.constant 6 : index
    %c0_315 = arith.constant 0 : index
    %c0_316 = arith.constant 0 : index
    %449 = vector.load %arg16[%c6_314, %c0_315, %c0_316] : memref<8x16x128xf32, #tpu.memory_space<vmem>>, vector<1x16x128xf32>
    %450 = vector.shape_cast %449 : vector<1x16x128xf32> to vector<16x128xf32>
    %c6_317 = arith.constant 6 : index
    %c0_318 = arith.constant 0 : index
    %451 = vector.load %arg20[%c6_317, %c0_318] : memref<16x128xf32, #tpu.memory_space<vmem>>, vector<1x128xf32>
    %452 = vector.shape_cast %451 : vector<1x128xf32> to vector<1x128xf32>
    %453 = vector.broadcast %452 : vector<1x128xf32> to vector<16x128xf32>
    %454 = arith.mulf %450, %453 : vector<16x128xf32>
    %455 = arith.addf %441, %454 : vector<16x128xf32>
    %c7_319 = arith.constant 7 : index
    %c0_320 = arith.constant 0 : index
    %c0_321 = arith.constant 0 : index
    %456 = vector.load %arg16[%c7_319, %c0_320, %c0_321] : memref<8x16x128xf32, #tpu.memory_space<vmem>>, vector<1x16x128xf32>
    %457 = vector.shape_cast %456 : vector<1x16x128xf32> to vector<16x128xf32>
    %c7_322 = arith.constant 7 : index
    %c0_323 = arith.constant 0 : index
    %458 = vector.load %arg20[%c7_322, %c0_323] : memref<16x128xf32, #tpu.memory_space<vmem>>, vector<1x128xf32>
    %459 = vector.shape_cast %458 : vector<1x128xf32> to vector<1x128xf32>
    %460 = vector.broadcast %459 : vector<1x128xf32> to vector<16x128xf32>
    %461 = arith.mulf %457, %460 : vector<16x128xf32>
    %462 = arith.addf %448, %461 : vector<16x128xf32>
    %463 = arith.addf %455, %462 : vector<16x128xf32>
    %464 = tpu.transpose %463, [1, 0] : vector<16x128xf32> -> vector<128x16xf32>
    %465 = arith.index_cast %9 : i32 to index
    %c0_324 = arith.constant 0 : index
    %466 = vector.load %arg18[%465, %c0_324] : memref<128x16xf32, #tpu.memory_space<vmem>>, vector<128x16xf32>
    tpu.vector_store %arg18[%465, %c0_324], %464 {strides = array<i32>} : memref<128x16xf32, #tpu.memory_space<vmem>>, vector<128x16xf32>,
    %c1_i32 = arith.constant 1 : i32
    return
  }
  func.func @transform_0(%arg0: i32) -> (i32, i32) {
    %c0_i32 = arith.constant 0 : i32
    %c0_i32_0 = arith.constant 0 : i32
    return %arg0, %c0_i32 : i32, i32
  }
  func.func @transform_1(%arg0: i32) -> (i32, i32, i32) {
    %c0_i32 = arith.constant 0 : i32
    %c0_i32_0 = arith.constant 0 : i32
    %c0_i32_1 = arith.constant 0 : i32
    %c0_i32_2 = arith.constant 0 : i32
    return %c0_i32, %c0_i32_0, %c0_i32_1 : i32, i32, i32
  }
  func.func @transform_2(%arg0: i32) -> (i32, i32) {
    %c0_i32 = arith.constant 0 : i32
    %c0_i32_0 = arith.constant 0 : i32
    %c0_i32_1 = arith.constant 0 : i32
    return %c0_i32, %c0_i32_0 : i32, i32
  }
  func.func @transform_3(%arg0: i32) -> (i32, i32, i32) {
    %c0_i32 = arith.constant 0 : i32
    %c0_i32_0 = arith.constant 0 : i32
    %c0_i32_1 = arith.constant 0 : i32
    %c0_i32_2 = arith.constant 0 : i32
    return %c0_i32, %c0_i32_0, %c0_i32_1 : i32, i32, i32
  }
  func.func @transform_4(%arg0: i32) -> (i32, i32) {
    %c0_i32 = arith.constant 0 : i32
    %c0_i32_0 = arith.constant 0 : i32
    %c0_i32_1 = arith.constant 0 : i32
    return %c0_i32, %c0_i32_0 : i32, i32
  }
  func.func @transform_5(%arg0: i32) -> (i32, i32, i32) {
    %c0_i32 = arith.constant 0 : i32
    %c0_i32_0 = arith.constant 0 : i32
    %c0_i32_1 = arith.constant 0 : i32
    %c0_i32_2 = arith.constant 0 : i32
    return %c0_i32, %c0_i32_0, %c0_i32_1 : i32, i32, i32
  }
  func.func @transform_6(%arg0: i32) -> (i32, i32) {
    %c0_i32 = arith.constant 0 : i32
    %c0_i32_0 = arith.constant 0 : i32
    %c0_i32_1 = arith.constant 0 : i32
    return %c0_i32, %c0_i32_0 : i32, i32
  }
  func.func @transform_7(%arg0: i32) -> (i32, i32, i32) {
    %c0_i32 = arith.constant 0 : i32
    %c0_i32_0 = arith.constant 0 : i32
    %c0_i32_1 = arith.constant 0 : i32
    %c0_i32_2 = arith.constant 0 : i32
    return %c0_i32, %c0_i32_0, %c0_i32_1 : i32, i32, i32
  }
  func.func @transform_8(%arg0: i32) -> (i32, i32) {
    %c0_i32 = arith.constant 0 : i32
    %c0_i32_0 = arith.constant 0 : i32
    %c0_i32_1 = arith.constant 0 : i32
    return %c0_i32, %c0_i32_0 : i32, i32
  }
  func.func @transform_9(%arg0: i32) -> (i32, i32, i32) {
    %c0_i32 = arith.constant 0 : i32
    %c0_i32_0 = arith.constant 0 : i32
    %c0_i32_1 = arith.constant 0 : i32
    %c0_i32_2 = arith.constant 0 : i32
    return %c0_i32, %c0_i32_0, %c0_i32_1 : i32, i32, i32
  }
  func.func @transform_10(%arg0: i32) -> (i32, i32) {
    %c0_i32 = arith.constant 0 : i32
    %c0_i32_0 = arith.constant 0 : i32
    %c0_i32_1 = arith.constant 0 : i32
    return %c0_i32, %c0_i32_0 : i32, i32
  }
  func.func @transform_11(%arg0: i32) -> (i32, i32, i32) {
    %c0_i32 = arith.constant 0 : i32
    %c0_i32_0 = arith.constant 0 : i32
    %c0_i32_1 = arith.constant 0 : i32
    %c0_i32_2 = arith.constant 0 : i32
    return %c0_i32, %c0_i32_0, %c0_i32_1 : i32, i32, i32
  }
  func.func @transform_12(%arg0: i32) -> (i32, i32) {
    %c0_i32 = arith.constant 0 : i32
    %c0_i32_0 = arith.constant 0 : i32
    %c0_i32_1 = arith.constant 0 : i32
    return %c0_i32, %c0_i32_0 : i32, i32
  }
  func.func @transform_13(%arg0: i32) -> (i32, i32, i32) {
    %c0_i32 = arith.constant 0 : i32
    %c0_i32_0 = arith.constant 0 : i32
    %c0_i32_1 = arith.constant 0 : i32
    %c0_i32_2 = arith.constant 0 : i32
    return %c0_i32, %c0_i32_0, %c0_i32_1 : i32, i32, i32
  }
  func.func @transform_14(%arg0: i32) -> (i32, i32) {
    %c0_i32 = arith.constant 0 : i32
    %c0_i32_0 = arith.constant 0 : i32
    %c0_i32_1 = arith.constant 0 : i32
    return %c0_i32, %c0_i32_0 : i32, i32
  }
  func.func @transform_15(%arg0: i32) -> (i32, i32, i32) {
    %c0_i32 = arith.constant 0 : i32
    %c0_i32_0 = arith.constant 0 : i32
    %c0_i32_1 = arith.constant 0 : i32
    %c0_i32_2 = arith.constant 0 : i32
    return %c0_i32, %c0_i32_0, %c0_i32_1 : i32, i32, i32
  }
  func.func @transform_16(%arg0: i32) -> (i32, i32) {
    %c0_i32 = arith.constant 0 : i32
    %c0_i32_0 = arith.constant 0 : i32
    %c0_i32_1 = arith.constant 0 : i32
    return %c0_i32, %c0_i32_0 : i32, i32
  }
  func.func @transform_17(%arg0: i32) -> (i32, i32) {
    %c0_i32 = arith.constant 0 : i32
    %c0_i32_0 = arith.constant 0 : i32
    return %arg0, %c0_i32 : i32, i32
  }
}

</mosaic_0001>

<bundles_post_ra>
// kernel: tpu_custom_call.1
= control target key start
LH: loop header
LB: loop body
LE: loop exit
PB: predicated region body
PF: predicated region fallthrough
CT: control target
= control target key end

     0   :  { %6 = vsyncpa [#allocation3], 0  ;;  %s124_s0 = inlined_call_operand.hbm [shape: f32[8,128], index: 0, kind: input, shape index: {}]   ;;  %s125_s1 = inlined_call_operand.hbm [shape: f32[8,128], index: 1, kind: output, shape index: {}]  }
   0x1   :  { %7 = vsyncpa [#allocation4], 0  ;;  %s88_s6 = smov [#allocation2]   ;;  %s40_s10 = scalar_lea.hbm %s124_s0, 128 }
   0x2   :  { %s14_s7 = sshll.u32 %s88_s6, 4  ;;  %p41_p0 = scmp.ne.s32.totalorder %s124_s0, %s40_s10  ;;  %s15_s7 = int_to_ptr.vmem [resolvable:$true] %s14_s7 }
   0x3   :  { %p44_p1 = scmp.lt.u32.totalorder %s40_s10, %s124_s0 }
   0x5   :  { %p46_p2 = pnand %p44_p1, %p41_p0 }
   0x7   :  { %49 = shalt.err (!%p46_p2)
}
   0x8   :  { %s50_s15 = scalar_lea.vmem %s15_s7, 128  ;;  %p55_p4 = scmp.lt.s32.totalorder %s15_s7, %s15_s7 }
   0x9   :  { %p51_p3 = scmp.ne.s32.totalorder %s15_s7, %s50_s15  ;;  %p56_p5 = scmp.lt.s32.totalorder %s50_s15, %s50_s15 }
   0xb   :  { %p57_p6 = por %p56_p5, %p55_p4 }
   0xd   :  { %p58_p7 = pnand %p57_p6, %p51_p3 }
   0xf   :  { %61 = shalt.err (!%p58_p7)
}
  0x10   :  { %17 = dma.hbm_to_vmem [thread:$0]  %s124_s0, 128, %s15_s7, [#allocation3]  }
  0x11   :  { %84 = dma.done.wait [#allocation3], 128  }
  0x12   :  { %85 = vsyncadd [#allocation3], 4294967168  ;;  %s89_s18 = smov [#allocation5]   ;;  %v21_v0 = vld [vmem:[#allocation2 + $0x1] ss:$0 sm:$0xff] }
  0x13   :  { %s29_s19 = sshll.u32 %s89_s18, 4  ;;  %22 = vst [vmem:[#allocation5] sm:$0xff] %v21_v0  ;;  %s30_s19 = int_to_ptr.vmem [resolvable:$true] %s29_s19 }
  0x14   :  { %s62_s20 = scalar_lea.vmem %s30_s19, 128  ;;  %p67_p9 = scmp.lt.s32.totalorder %s30_s19, %s30_s19 }
  0x15   :  { %p63_p8 = scmp.ne.s32.totalorder %s30_s19, %s62_s20  ;;  %p68_p10 = scmp.lt.s32.totalorder %s62_s20, %s62_s20 }
  0x17   :  { %p69_p11 = por %p68_p10, %p67_p9 }
  0x19   :  { %p70_p12 = pnand %p69_p11, %p63_p8 }
  0x1b   :  { %73 = shalt.err (!%p70_p12)
}
  0x1c   :  { %s74_s23 = scalar_lea.hbm %s125_s1, 128 }
  0x1d   :  { %p75_p13 = scmp.ne.s32.totalorder %s125_s1, %s74_s23  ;;  %p78_p0 = scmp.lt.u32.totalorder %s74_s23, %s125_s1 }
  0x1f   :  { %p80_p1 = pnand %p78_p0, %p75_p13 }
  0x21   :  { %83 = shalt.err (!%p80_p1)
}
  0x22   :  { %32 = dma.vmem_to_hbm [thread:$0]  %s30_s19, 128, %s125_s1, [#allocation4]  }
  0x23   :  { %86 = dma.done.wait [#allocation4], 128  }
  0x24   :  { %87 = vsyncadd [#allocation4], 4294967168 }
  0x25   :  { %36 = vsyncpa [#allocation3], 1 }
  0x26   :  { %37 = vsyncpa [#allocation4], 1 }

// kernel: tpu_custom_call.1
= control target key start
LH: loop header
LB: loop body
LE: loop exit
PB: predicated region body
PF: predicated region fallthrough
CT: control target
= control target key end

     0   :  { %s1768_s0 = inlined_call_operand.vmem [shape: f32[128,16], index: 0, kind: input, shape index: {}]   ;;  %s1769_s1 = inlined_call_operand.vmem [shape: f32[16,8,128], index: 1, kind: input, shape index: {}]   ;;  %s1770_s2 = inlined_call_operand.hbm [shape: f32[8,128], index: 2, kind: input, shape index: {}]   ;;  %s1771_s3 = inlined_call_operand.hbm [shape: f32[4,8,128], index: 3, kind: input, shape index: {}]   ;;  %s1772_s4 = inlined_call_operand.hbm [shape: f32[8,128], index: 4, kind: input, shape index: {}]   ;;  %s1773_s5 = inlined_call_operand.hbm [shape: f32[8,8,128], index: 5, kind: input, shape index: {}]   ;;  %s1774_s6 = inlined_call_operand.hbm [shape: f32[8,128], index: 6, kind: input, shape index: {}]   ;;  %s1775_s7 = inlined_call_operand.vmem [shape: f32[5,8,128], index: 7, kind: input, shape index: {}]   ;;  %s1776_s8 = inlined_call_operand.hbm [shape: f32[8,128], index: 8, kind: input, shape index: {}]   ;;  %s1777_s9 = inlined_call_operand.hbm [shape: f32[3,8,128], index: 9, kind: input, shape index: {}]   ;;  %s1778_s10 = inlined_call_operand.hbm [shape: f32[8,128], index: 10, kind: input, shape index: {}]   ;;  %s1779_s11 = inlined_call_operand.hbm [shape: f32[6,16,128], index: 11, kind: input, shape index: {}]   ;;  %s1780_s12 = inlined_call_operand.vmem [shape: f32[16,128], index: 12, kind: input, shape index: {}]   ;;  %s1781_s13 = inlined_call_operand.hbm [shape: f32[10,8,128], index: 13, kind: input, shape index: {}]   ;;  %s1782_s14 = inlined_call_operand.hbm [shape: f32[8,128], index: 14, kind: input, shape index: {}]   ;;  %s1783_s15 = inlined_call_operand.hbm [shape: f32[8,16,128], index: 15, kind: input, shape index: {}]   ;;  %s1784_s16 = inlined_call_operand.vmem [shape: f32[16,128], index: 16, kind: input, shape index: {}]   ;;  %s1785_s17 = inlined_call_operand.vmem [shape: f32[128,16], index: 17, kind: output, shape index: {}]  }
   0x1   :  { %1789 = sst [smem:[#allocation30_spill]] %s1768_s0 }
   0x2   :  { %1790 = sst [smem:[#allocation31_spill]] %s1769_s1 }
   0x3   :  { %1791 = sst [smem:[#allocation32_spill]] %s1785_s17 }
   0x4   :  { %22 = vsyncpa [#allocation5], 0 }
   0x5   :  { %23 = vsyncpa [#allocation7], 0 }
   0x6   :  { %24 = vsyncpa [#allocation10], 0 }
   0x7   :  { %25 = vsyncpa [#allocation13], 0 }
   0x8   :  { %26 = vsyncpa [#allocation16], 0 }
   0x9   :  { %27 = vsyncpa [#allocation19], 0 }
   0xa   :  { %28 = vsyncpa [#allocation22], 0  ;;  %s1315_s24 = smov [#allocation6]   ;;  %s1037_s28 = scalar_lea.hbm %s1771_s3, 512 }
   0xb   :  { %s48_s25 = sshll.u32 %s1315_s24, 4  ;;  %p1038_p0 = scmp.ne.s32.totalorder %s1771_s3, %s1037_s28  ;;  %s49_s25 = int_to_ptr.vmem [resolvable:$true] %s48_s25 }
   0xc   :  { %p1041_p1 = scmp.lt.u32.totalorder %s1037_s28, %s1771_s3 }
   0xe   :  { %p1043_p2 = pnand %p1041_p1, %p1038_p0 }
  0x10   :  { %1046 = shalt.err (!%p1043_p2)
}
  0x11   :  { %s1047_s19 = scalar_lea.vmem %s49_s25, 512  ;;  %p1052_p4 = scmp.lt.s32.totalorder %s49_s25, %s49_s25 }
  0x12   :  { %p1048_p3 = scmp.ne.s32.totalorder %s49_s25, %s1047_s19  ;;  %p1053_p5 = scmp.lt.s32.totalorder %s1047_s19, %s1047_s19 }
  0x14   :  { %p1054_p6 = por %p1053_p5, %p1052_p4 }
  0x16   :  { %p1055_p7 = pnand %p1054_p6, %p1048_p3 }
  0x18   :  { %1058 = shalt.err (!%p1055_p7)
}
  0x19   :  { %s1316_s1 = smov 128   ;;  %s1317_s20 = smov 8  }
  0x1a   :  { %54 = dma.hbm_to_vmem [thread:$0]  %s1771_s3, 512, %s49_s25, [#allocation7], %s1316_s1, %s1316_s1, %s1317_s20  }
  0x1b   :  { %s1318_s23 = smov [#allocation9]   ;;  %s1319_s26 = smov [#allocation12]  }
  0x1c   :  { %s70_s24 = sshll.u32 %s1318_s23, 4  ;;  %s95_s27 = sshll.u32 %s1319_s26, 4  ;;  %s71_s24 = int_to_ptr.vmem [resolvable:$true] %s70_s24  ;;  %s96_s27 = int_to_ptr.vmem [resolvable:$true] %s95_s27 }
  0x1d   :  { %s1059_s0 = scalar_lea.hbm %s1773_s5, 1024 }
  0x1e   :  { %p1060_p8 = scmp.ne.s32.totalorder %s1773_s5, %s1059_s0  ;;  %p1063_p9 = scmp.lt.u32.totalorder %s1059_s0, %s1773_s5 }
  0x20   :  { %p1065_p10 = pnand %p1063_p9, %p1060_p8 }
  0x22   :  { %1068 = shalt.err (!%p1065_p10)
}
  0x23   :  { %s1069_s3 = scalar_lea.vmem %s71_s24, 1024  ;;  %p1074_p12 = scmp.lt.s32.totalorder %s71_s24, %s71_s24 }
  0x24   :  { %p1070_p11 = scmp.ne.s32.totalorder %s71_s24, %s1069_s3  ;;  %p1075_p13 = scmp.lt.s32.totalorder %s1069_s3, %s1069_s3 }
  0x26   :  { %p1076_p0 = por %p1075_p13, %p1074_p12 }
  0x28   :  { %p1077_p1 = pnand %p1076_p0, %p1070_p11 }
  0x2a   :  { %1080 = shalt.err (!%p1077_p1)
}
  0x2b   :  { %76 = dma.hbm_to_vmem [thread:$0]  %s1773_s5, 1024, %s71_s24, [#allocation10], %s1316_s1, %s1316_s1, %s1317_s20  }
  0x2c   :  { %s1081_s23 = scalar_lea.hbm %s1776_s8, 128 }
  0x2d   :  { %p1082_p2 = scmp.ne.s32.totalorder %s1776_s8, %s1081_s23  ;;  %p1085_p3 = scmp.lt.u32.totalorder %s1081_s23, %s1776_s8 }
  0x2f   :  { %p1087_p4 = pnand %p1085_p3, %p1082_p2 }
  0x31   :  { %1090 = shalt.err (!%p1087_p4)
}
  0x32   :  { %s1091_s30 = scalar_lea.vmem %s96_s27, 128  ;;  %p1096_p6 = scmp.lt.s32.totalorder %s96_s27, %s96_s27 }
  0x33   :  { %p1092_p5 = scmp.ne.s32.totalorder %s96_s27, %s1091_s30  ;;  %p1097_p7 = scmp.lt.s32.totalorder %s1091_s30, %s1091_s30 }
  0x35   :  { %p1098_p8 = por %p1097_p7, %p1096_p6 }
  0x37   :  { %p1099_p9 = pnand %p1098_p8, %p1092_p5 }
  0x39   :  { %1102 = shalt.err (!%p1099_p9)
}
  0x3a   :  { %98 = dma.hbm_to_vmem [thread:$0]  %s1776_s8, 128, %s96_s27, [#allocation13]  }
  0x3b   :  { %s1320_s18 = smov [#allocation15]   ;;  %s1321_s3 = smov [#allocation18]  }
  0x3c   :  { %s117_s19 = sshll.u32 %s1320_s18, 4  ;;  %s140_s25 = sshll.u32 %s1321_s3, 4  ;;  %s118_s19 = int_to_ptr.vmem [resolvable:$true] %s117_s19  ;;  %s141_s25 = int_to_ptr.vmem [resolvable:$true] %s140_s25 }
  0x3d   :  { %s1103_s17 = scalar_lea.hbm %s1778_s10, 128 }
  0x3e   :  { %p1104_p10 = scmp.ne.s32.totalorder %s1778_s10, %s1103_s17  ;;  %p1107_p11 = scmp.lt.u32.totalorder %s1103_s17, %s1778_s10 }
  0x40   :  { %p1109_p12 = pnand %p1107_p11, %p1104_p10 }
  0x42   :  { %1112 = shalt.err (!%p1109_p12)
}
  0x43   :  { %s1113_s8 = scalar_lea.vmem %s118_s19, 128  ;;  %p1118_p0 = scmp.lt.s32.totalorder %s118_s19, %s118_s19 }
  0x44   :  { %p1114_p13 = scmp.ne.s32.totalorder %s118_s19, %s1113_s8  ;;  %p1119_p1 = scmp.lt.s32.totalorder %s1113_s8, %s1113_s8 }
  0x46   :  { %p1120_p2 = por %p1119_p1, %p1118_p0 }
  0x48   :  { %p1121_p3 = pnand %p1120_p2, %p1114_p13 }
  0x4a   :  { %1124 = shalt.err (!%p1121_p3)
}
  0x4b   :  { %120 = dma.hbm_to_vmem [thread:$0]  %s1778_s10, 128, %s118_s19, [#allocation16]  }
  0x4c   :  { %s1125_s24 = scalar_lea.hbm %s1781_s13, 1280 }
  0x4d   :  { %p1126_p4 = scmp.ne.s32.totalorder %s1781_s13, %s1125_s24  ;;  %p1129_p5 = scmp.lt.u32.totalorder %s1125_s24, %s1781_s13 }
  0x4f   :  { %p1131_p6 = pnand %p1129_p5, %p1126_p4 }
  0x51   :  { %1134 = shalt.err (!%p1131_p6)
}
  0x52   :  { %s1135_s17 = scalar_lea.vmem %s141_s25, 1280  ;;  %p1140_p8 = scmp.lt.s32.totalorder %s141_s25, %s141_s25 }
  0x53   :  { %p1136_p7 = scmp.ne.s32.totalorder %s141_s25, %s1135_s17  ;;  %p1141_p9 = scmp.lt.s32.totalorder %s1135_s17, %s1135_s17 }
  0x55   :  { %p1142_p10 = por %p1141_p9, %p1140_p8 }
  0x57   :  { %p1143_p11 = pnand %p1142_p10, %p1136_p7 }
  0x59   :  { %1146 = shalt.err (!%p1143_p11)
}
  0x5a   :  { %146 = dma.hbm_to_vmem [thread:$0]  %s1781_s13, 1280, %s141_s25, [#allocation19], %s1316_s1, %s1316_s1, %s1317_s20  }
  0x5b   :  { %s1322_s23 = smov [#allocation4]   ;;  %s1323_s28 = smov [#allocation8]  }
  0x5c   :  { %s39_s26 = sshll.u32 %s1322_s23, 4  ;;  %s61_s29 = sshll.u32 %s1323_s28, 4  ;;  %s40_s26 = int_to_ptr.vmem [resolvable:$true] %s39_s26  ;;  %s62_s29 = int_to_ptr.vmem [resolvable:$true] %s61_s29 }
  0x5d   :  { %s1147_s0 = scalar_lea.hbm %s1770_s2, 128 }
  0x5e   :  { %p1148_p12 = scmp.ne.s32.totalorder %s1770_s2, %s1147_s0  ;;  %p1151_p13 = scmp.lt.u32.totalorder %s1147_s0, %s1770_s2 }
  0x60   :  { %p1153_p0 = pnand %p1151_p13, %p1148_p12 }
  0x62   :  { %1156 = shalt.err (!%p1153_p0)
}
  0x63   :  { %s1157_s13 = scalar_lea.vmem %s40_s26, 128  ;;  %p1162_p2 = scmp.lt.s32.totalorder %s40_s26, %s40_s26 }
  0x64   :  { %p1158_p1 = scmp.ne.s32.totalorder %s40_s26, %s1157_s13  ;;  %p1163_p3 = scmp.lt.s32.totalorder %s1157_s13, %s1157_s13 }
  0x66   :  { %p1164_p4 = por %p1163_p3, %p1162_p2 }
  0x68   :  { %p1165_p5 = pnand %p1164_p4, %p1158_p1 }
  0x6a   :  { %1168 = shalt.err (!%p1165_p5)
}
  0x6b   :  { %42 = dma.hbm_to_vmem [thread:$0]  %s1770_s2, 128, %s40_s26, [#allocation5]  }
  0x6c   :  { %s1169_s17 = scalar_lea.hbm %s1772_s4, 128 }
  0x6d   :  { %p1170_p6 = scmp.ne.s32.totalorder %s1772_s4, %s1169_s17  ;;  %p1173_p7 = scmp.lt.u32.totalorder %s1169_s17, %s1772_s4 }
  0x6f   :  { %p1175_p8 = pnand %p1173_p7, %p1170_p6 }
  0x71   :  { %1178 = shalt.err (!%p1175_p8)
}
  0x72   :  { %s1179_s8 = scalar_lea.vmem %s62_s29, 128  ;;  %p1184_p10 = scmp.lt.s32.totalorder %s62_s29, %s62_s29 }
  0x73   :  { %p1180_p9 = scmp.ne.s32.totalorder %s62_s29, %s1179_s8  ;;  %p1185_p11 = scmp.lt.s32.totalorder %s1179_s8, %s1179_s8 }
  0x75   :  { %p1186_p12 = por %p1185_p11, %p1184_p10 }
  0x77   :  { %p1187_p13 = pnand %p1186_p12, %p1180_p9 }
  0x79   :  { %1190 = shalt.err (!%p1187_p13)
}
  0x7a   :  { %64 = dma.hbm_to_vmem [thread:$0]  %s1772_s4, 128, %s62_s29, [#allocation7]  }
  0x7b   :  { %s1324_s27 = smov [#allocation11]   ;;  %s1325_s30 = smov [#allocation14]  }
  0x7c   :  { %s83_s0 = sshll.u32 %s1324_s27, 4  ;;  %s104_s5 = sshll.u32 %s1325_s30, 4  ;;  %s84_s0 = int_to_ptr.vmem [resolvable:$true] %s83_s0  ;;  %s105_s5 = int_to_ptr.vmem [resolvable:$true] %s104_s5 }
  0x7d   :  { %s1191_s13 = scalar_lea.hbm %s1774_s6, 128 }
  0x7e   :  { %p1192_p0 = scmp.ne.s32.totalorder %s1774_s6, %s1191_s13  ;;  %p1195_p1 = scmp.lt.u32.totalorder %s1191_s13, %s1774_s6 }
  0x80   :  { %p1197_p2 = pnand %p1195_p1, %p1192_p0 }
  0x82   :  { %1200 = shalt.err (!%p1197_p2)
}
  0x83   :  { %s1201_s4 = scalar_lea.vmem %s84_s0, 128  ;;  %p1206_p4 = scmp.lt.s32.totalorder %s84_s0, %s84_s0 }
  0x84   :  { %p1202_p3 = scmp.ne.s32.totalorder %s84_s0, %s1201_s4  ;;  %p1207_p5 = scmp.lt.s32.totalorder %s1201_s4, %s1201_s4 }
  0x86   :  { %p1208_p6 = por %p1207_p5, %p1206_p4 }
  0x88   :  { %p1209_p7 = pnand %p1208_p6, %p1202_p3 }
  0x8a   :  { %1212 = shalt.err (!%p1209_p7)
}
  0x8b   :  { %86 = dma.hbm_to_vmem [thread:$0]  %s1774_s6, 128, %s84_s0, [#allocation10]  }
  0x8c   :  { %s1213_s23 = scalar_lea.hbm %s1777_s9, 384 }
  0x8d   :  { %p1214_p8 = scmp.ne.s32.totalorder %s1777_s9, %s1213_s23  ;;  %p1217_p9 = scmp.lt.u32.totalorder %s1213_s23, %s1777_s9 }
  0x8f   :  { %p1219_p10 = pnand %p1217_p9, %p1214_p8 }
  0x91   :  { %1222 = shalt.err (!%p1219_p10)
}
  0x92   :  { %s1223_s27 = scalar_lea.vmem %s105_s5, 384  ;;  %p1228_p12 = scmp.lt.s32.totalorder %s105_s5, %s105_s5 }
  0x93   :  { %p1224_p11 = scmp.ne.s32.totalorder %s105_s5, %s1223_s27  ;;  %p1229_p13 = scmp.lt.s32.totalorder %s1223_s27, %s1223_s27 }
  0x95   :  { %p1230_p0 = por %p1229_p13, %p1228_p12 }
  0x97   :  { %p1231_p1 = pnand %p1230_p0, %p1224_p11 }
  0x99   :  { %1234 = shalt.err (!%p1231_p1)
}
  0x9a   :  { %110 = dma.hbm_to_vmem [thread:$0]  %s1777_s9, 384, %s105_s5, [#allocation13], %s1316_s1, %s1316_s1, %s1317_s20  }
  0x9b   :  { %s1326_s30 = smov [#allocation17]   ;;  %s1327_s18 = smov [#allocation20]  }
  0x9c   :  { %s126_s24 = sshll.u32 %s1326_s30, 4  ;;  %s153_s13 = sshll.u32 %s1327_s18, 4  ;;  %s127_s24 = int_to_ptr.vmem [resolvable:$true] %s126_s24  ;;  %s154_s13 = int_to_ptr.vmem [resolvable:$true] %s153_s13 }
  0x9d   :  { %s1235_s21 = scalar_lea.hbm %s1779_s11, 1536 }
  0x9e   :  { %p1236_p2 = scmp.ne.s32.totalorder %s1779_s11, %s1235_s21  ;;  %p1239_p3 = scmp.lt.u32.totalorder %s1235_s21, %s1779_s11 }
  0xa0   :  { %p1241_p4 = pnand %p1239_p3, %p1236_p2 }
  0xa2   :  { %1244 = shalt.err (!%p1241_p4)
}
  0xa3   :  { %s1245_s9 = scalar_lea.vmem %s127_s24, 1536  ;;  %p1250_p6 = scmp.lt.s32.totalorder %s127_s24, %s127_s24 }
  0xa4   :  { %p1246_p5 = scmp.ne.s32.totalorder %s127_s24, %s1245_s9  ;;  %p1251_p7 = scmp.lt.s32.totalorder %s1245_s9, %s1245_s9 }
  0xa6   :  { %p1252_p8 = por %p1251_p7, %p1250_p6 }
  0xa8   :  { %p1253_p9 = pnand %p1252_p8, %p1246_p5 }
  0xaa   :  { %1256 = shalt.err (!%p1253_p9)
}
  0xab   :  { %132 = dma.hbm_to_vmem [thread:$0]  %s1779_s11, 1536, %s127_s24, [#allocation16], %s1316_s1, %s1316_s1, %s1317_s20  }
  0xac   :  { %s1257_s28 = scalar_lea.hbm %s1782_s14, 128 }
  0xad   :  { %p1258_p10 = scmp.ne.s32.totalorder %s1782_s14, %s1257_s28  ;;  %p1261_p11 = scmp.lt.u32.totalorder %s1257_s28, %s1782_s14 }
  0xaf   :  { %p1263_p12 = pnand %p1261_p11, %p1258_p10 }
  0xb1   :  { %1266 = shalt.err (!%p1263_p12)
}
  0xb2   :  { %s1267_s6 = scalar_lea.vmem %s154_s13, 128  ;;  %p1272_p0 = scmp.lt.s32.totalorder %s154_s13, %s154_s13 }
  0xb3   :  { %p1268_p13 = scmp.ne.s32.totalorder %s154_s13, %s1267_s6  ;;  %p1273_p1 = scmp.lt.s32.totalorder %s1267_s6, %s1267_s6 }
  0xb5   :  { %p1274_p2 = por %p1273_p1, %p1272_p0 }
  0xb7   :  { %p1275_p3 = pnand %p1274_p2, %p1268_p13 }
  0xb9   :  { %1278 = shalt.err (!%p1275_p3)
}
  0xba   :  { %156 = dma.hbm_to_vmem [thread:$0]  %s1782_s14, 128, %s154_s13, [#allocation19]  }
  0xbb   :  { %s1328_s30 = smov [#allocation21]   ;;  %s1279_s3 = scalar_lea.hbm %s1783_s15, 2048 }
  0xbc   :  { %s162_s24 = sshll.u32 %s1328_s30, 4  ;;  %p1280_p4 = scmp.ne.s32.totalorder %s1783_s15, %s1279_s3  ;;  %s163_s24 = int_to_ptr.vmem [resolvable:$true] %s162_s24 }
  0xbd   :  { %p1283_p5 = scmp.lt.u32.totalorder %s1279_s3, %s1783_s15 }
  0xbf   :  { %p1285_p6 = pnand %p1283_p5, %p1280_p4 }
  0xc1   :  { %1288 = shalt.err (!%p1285_p6)
}
  0xc2   :  { %s1289_s17 = scalar_lea.vmem %s163_s24, 2048  ;;  %p1294_p8 = scmp.lt.s32.totalorder %s163_s24, %s163_s24 }
  0xc3   :  { %p1290_p7 = scmp.ne.s32.totalorder %s163_s24, %s1289_s17  ;;  %p1295_p9 = scmp.lt.s32.totalorder %s1289_s17, %s1289_s17 }
  0xc5   :  { %p1296_p10 = por %p1295_p9, %p1294_p8 }
  0xc7   :  { %p1297_p11 = pnand %p1296_p10, %p1290_p7 }
  0xc9   :  { %1300 = shalt.err (!%p1297_p11)
}
  0xca   :  { %168 = dma.hbm_to_vmem [thread:$0]  %s1783_s15, 2048, %s163_s24, [#allocation22], %s1316_s1, %s1316_s1, %s1317_s20  }
  0xcb   :  { %1301 = dma.done.wait [#allocation5], 128  }
  0xcc   :  { %1302 = vsyncadd [#allocation5], 4294967168 }
  0xcd   :  { %1303 = dma.done.wait [#allocation7], 640  }
  0xce   :  { %1304 = vsyncadd [#allocation7], 4294966656 }
  0xcf   :  { %1305 = dma.done.wait [#allocation10], 1152  }
  0xd0   :  { %1306 = vsyncadd [#allocation10], 4294966144 }
  0xd1   :  { %1307 = dma.done.wait [#allocation13], 512  }
  0xd2   :  { %1308 = vsyncadd [#allocation13], 4294966784 }
  0xd3   :  { %1309 = dma.done.wait [#allocation16], 1664  }
  0xd4   :  { %1310 = vsyncadd [#allocation16], 4294965632 }
  0xd5   :  { %1311 = dma.done.wait [#allocation19], 1408  }
  0xd6   :  { %1312 = vsyncadd [#allocation19], 4294965888 }
  0xd7   :  { %1313 = dma.done.wait [#allocation22], 2048  }
  0xd8   :  { %1314 = vsyncadd [#allocation22], 4294965248  ;;  %s1792_s10 = sld [smem:[#allocation30_spill]]  ;;  %s1793_s28 = sld [smem:[#allocation31_spill]]  ;;  %v207_v22 = vld [vmem:[#allocation4] sm:$0xff]  ;;  %vm899_vm0 = vcmask 130048  }
  0xd9   :  { %s1794_s13 = sld [smem:[#allocation32_spill]] }
  0xde   :  { %v217_v0 = vld [vmem:[%s1792_s10] sm:$0xff]  ;;  %v218_v1 = vld [vmem:[%s1792_s10 + $0x8] sm:$0xff]  ;;  %v219_v2 = vld [vmem:[%s1792_s10 + $0x10] sm:$0xff] }
  0xdf   :  { %233 = vxpose.xlu0.b32.start [1/16] (narrow) %v217_v0, 16  ;;  %v220_v3 = vld [vmem:[%s1792_s10 + $0x18] sm:$0xff]  ;;  %v221_v4 = vld [vmem:[%s1792_s10 + $0x20] sm:$0xff]  ;;  %v222_v5 = vld [vmem:[%s1792_s10 + $0x28] sm:$0xff] }
  0xe0   :  { %v223_v6 = vld [vmem:[%s1792_s10 + $0x30] sm:$0xff]  ;;  %v224_v7 = vld [vmem:[%s1792_s10 + $0x38] sm:$0xff]  ;;  %v225_v8 = vld [vmem:[%s1792_s10 + $0x40] sm:$0xff] }
  0xe1   :  { %v226_v9 = vld [vmem:[%s1792_s10 + $0x48] sm:$0xff]  ;;  %v227_v10 = vld [vmem:[%s1792_s10 + $0x50] sm:$0xff]  ;;  %v228_v11 = vld [vmem:[%s1792_s10 + $0x58] sm:$0xff] }
  0xe2   :  { %v229_v12 = vld [vmem:[%s1792_s10 + $0x60] sm:$0xff]  ;;  %v230_v13 = vld [vmem:[%s1792_s10 + $0x68] sm:$0xff]  ;;  %v231_v14 = vld [vmem:[%s1792_s10 + $0x70] sm:$0xff] }
  0xe3   :  { %234 = vxpose.xlu0.b32.cont [2/16] (narrow) %v218_v1, 16  ;;  %v232_v15 = vld [vmem:[%s1792_s10 + $0x78] sm:$0xff]  ;;  %v267_v18 = vld [vmem:[%s1793_s28] sm:$0xff]  ;;  %v928_v19 = vld [vmem:[%s1793_s28 + $0x8] sm:$0xff] }
  0xe4   :  { %v930_v20 = vld [vmem:[%s1793_s28 + $0x10] sm:$0xff]  ;;  %v932_v21 = vld [vmem:[%s1793_s28 + $0x18] sm:$0xff]  ;;  %v934_v23 = vld [vmem:[%s1793_s28 + $0x20] sm:$0xff] }
  0xe5   :  { %v936_v27 = vld [vmem:[%s1793_s28 + $0x28] sm:$0xff]  ;;  %v938_v32 = vld [vmem:[%s1793_s28 + $0x30] sm:$0xff]  ;;  %v940_v33 = vld [vmem:[%s1793_s28 + $0x38] sm:$0xff] }
  0xe6   :  { %v942_v39 = vld [vmem:[%s1793_s28 + $0x40] sm:$0xff]  ;;  %v944_v40 = vld [vmem:[%s1793_s28 + $0x48] sm:$0xff]  ;;  %v948_v48 = vld [vmem:[%s1793_s28 + $0x58] sm:$0xff] }
  0xe7   :  { %235 = vxpose.xlu0.b32.cont [3/16] (narrow) %v219_v2, 16  ;;  %v946_v57 = vld [vmem:[%s1793_s28 + $0x50] sm:$0xff]  ;;  %v952_v60 = vld [vmem:[%s1793_s28 + $0x68] sm:$0xff]  ;;  %v950_v63 = vld [vmem:[%s1793_s28 + $0x60] sm:$0xff] }
  0xe8   :  { %v954_v2 = vld [vmem:[%s1793_s28 + $0x70] sm:$0xff] }
  0xeb   :  { %236 = vxpose.xlu0.b32.cont [4/16] (narrow) %v220_v3, 16 }
  0xef   :  { %237 = vxpose.xlu0.b32.cont [5/16] (narrow) %v221_v4, 16 }
  0xf3   :  { %238 = vxpose.xlu0.b32.cont [6/16] (narrow) %v222_v5, 16  ;;  %v956_v5 = vld [vmem:[%s1793_s28 + $0x78] sm:$0xff] }
  0xf7   :  { %239 = vxpose.xlu0.b32.cont [7/16] (narrow) %v223_v6, 16 }
  0xfb   :  { %240 = vxpose.xlu0.b32.cont [8/16] (narrow) %v224_v7, 16 }
  0xff   :  { %241 = vxpose.xlu0.b32.cont [9/16] (narrow) %v225_v8, 16 }
 0x103   :  { %242 = vxpose.xlu0.b32.cont [10/16] (narrow) %v226_v9, 16 }
 0x107   :  { %243 = vxpose.xlu0.b32.cont [11/16] (narrow) %v227_v10, 16 }
 0x10b   :  { %244 = vxpose.xlu0.b32.cont [12/16] (narrow) %v228_v11, 16 }
 0x10f   :  { %245 = vxpose.xlu0.b32.cont [13/16] (narrow) %v229_v12, 16 }
 0x113   :  { %246 = vxpose.xlu0.b32.cont [14/16] (narrow) %v230_v13, 16 }
 0x117   :  { %247 = vxpose.xlu0.b32.cont [15/16] (narrow) %v231_v14, 16 }
 0x11b   :  { %248 = vxpose.xlu0.b32.end [16/16] (narrow) %v232_v15, 16 }
 0x15f   :  { %v249_v16 = vpop.trf.xlu0 }
 0x160   :  { %265 = vst [vmem:[#allocation2] sm:$0xff] %v249_v16 }
 0x163   :  { %v250_v17 = vpop.trf.xlu0 }
 0x164   :  { %266 = vst [vmem:[#allocation2 + $0x8] sm:$0xff] %v250_v17 }
 0x167   :  { %v927_v24 = vld [vmem:[#allocation2] ss:$0 sm:$0xff]  ;;  %v929_v25 = vld [vmem:[#allocation2 + $0x1] ss:$0 sm:$0xff]  ;;  %v931_v26 = vld [vmem:[#allocation2 + $0x2] ss:$0 sm:$0xff] }
 0x168   :  { %v273_v28 = vmul.f32 %v927_v24, %v267_v18  ;;  %v282_v29 = vmul.f32 %v929_v25, %v928_v19  ;;  %v933_v30 = vld [vmem:[#allocation2 + $0x3] ss:$0 sm:$0xff]  ;;  %v937_v31 = vld [vmem:[#allocation2 + $0x5] ss:$0 sm:$0xff]  ;;  %v935_v35 = vld [vmem:[#allocation2 + $0x4] ss:$0 sm:$0xff]  ;;  %v291_v37 = vmul.f32 %v931_v26, %v930_v20 }
 0x169   :  { %v300_v34 = vmul.f32 %v933_v30, %v932_v21  ;;  %v941_v38 = vld [vmem:[#allocation2 + $0x7] ss:$0 sm:$0xff]  ;;  %v318_v42 = vmul.f32 %v937_v31, %v936_v27  ;;  %v939_v43 = vld [vmem:[#allocation2 + $0x6] ss:$0 sm:$0xff]  ;;  %v309_v47 = vmul.f32 %v935_v35, %v934_v23  ;;  %v413_v20 = vld [vmem:[#allocation6] sm:$0xff] }
 0x16a   :  { %v274_v36 = vadd.f32 %v273_v28, %v207_v22  ;;  %v336_v51 = vmul.f32 %v941_v38, %v940_v33  ;;  %v327_v54 = vmul.f32 %v939_v43, %v938_v32  ;;  %v422_v21 = vld [vmem:[#allocation6 + $0x8] sm:$0xff]  ;;  %v431_v22 = vld [vmem:[#allocation6 + $0x10] sm:$0xff]  ;;  %v440_v23 = vld [vmem:[#allocation6 + $0x18] sm:$0xff] }
 0x16b   :  { %v301_v41 = vadd.f32 %v300_v34, %v282_v29  ;;  %v943_v44 = vld [vmem:[#allocation2 + $0x8] ss:$0 sm:$0xff]  ;;  %v945_v45 = vld [vmem:[#allocation2 + $0x9] ss:$0 sm:$0xff]  ;;  %v949_v49 = vld [vmem:[#allocation2 + $0xb] ss:$0 sm:$0xff] }
 0x16c   :  { %v292_v46 = vadd.f32 %v291_v37, %v274_v36  ;;  %v354_v52 = vmul.f32 %v945_v45, %v944_v40  ;;  %v345_v55 = vmul.f32 %v943_v44, %v942_v39  ;;  %v947_v58 = vld [vmem:[#allocation2 + $0xa] ss:$0 sm:$0xff]  ;;  %v372_v59 = vmul.f32 %v949_v49, %v948_v48  ;;  %v953_v62 = vld [vmem:[#allocation2 + $0xd] ss:$0 sm:$0xff]  ;;  %v951_v1 = vld [vmem:[#allocation2 + $0xc] ss:$0 sm:$0xff] }
 0x16d   :  { %v319_v50 = vadd.f32 %v318_v42, %v301_v41  ;;  %v363_v4 = vmul.f32 %v947_v58, %v946_v57  ;;  %v390_v7 = vmul.f32 %v953_v62, %v952_v60  ;;  %v955_v8 = vld [vmem:[#allocation2 + $0xe] ss:$0 sm:$0xff]  ;;  %v957_v9 = vld [vmem:[#allocation2 + $0xf] ss:$0 sm:$0xff]  ;;  %v381_v11 = vmul.f32 %v951_v1, %v950_v63  ;;  %v451_v38 = vld [vmem:[#allocation9] sm:$0xff] }
 0x16e   :  { %v310_v53 = vadd.f32 %v309_v47, %v292_v46  ;;  %v399_v14 = vmul.f32 %v955_v8, %v954_v2  ;;  %v408_v15 = vmul.f32 %v957_v9, %v956_v5  ;;  %v208_v24 = vld [vmem:[#allocation8] sm:$0xff]  ;;  %v460_v39 = vld [vmem:[#allocation9 + $0x8] sm:$0xff]  ;;  %v469_v40 = vld [vmem:[#allocation9 + $0x10] sm:$0xff] }
 0x16f   :  { %v337_v56 = vadd.f32 %v336_v51, %v319_v50  ;;  %v478_v41 = vld [vmem:[#allocation9 + $0x18] sm:$0xff]  ;;  %v209_v42 = vld [vmem:[#allocation11] sm:$0xff]  ;;  %v496_v46 = vld [vmem:[#allocation9 + $0x28] sm:$0xff] }
 0x170   :  { %v328_v61 = vadd.f32 %v327_v54, %v310_v53  ;;  %v487_v51 = vld [vmem:[#allocation9 + $0x20] sm:$0xff]  ;;  %v505_v54 = vld [vmem:[#allocation9 + $0x30] sm:$0xff]  ;;  %v514_v57 = vld [vmem:[#allocation9 + $0x38] sm:$0xff] }
 0x171   :  { %v355_v0 = vadd.f32 %v354_v52, %v337_v56  ;;  %v525_v8 = vld [vmem:[%s1775_s7] sm:$0xff]  ;;  %v971_v9 = vld [vmem:[%s1775_s7 + $0x8] sm:$0xff] }
 0x172   :  { %v346_v3 = vadd.f32 %v345_v55, %v328_v61 }
 0x173   :  { %v373_v6 = vadd.f32 %v372_v59, %v355_v0 }
 0x174   :  { %v364_v10 = vadd.f32 %v363_v4, %v346_v3 }
 0x175   :  { %v391_v12 = vadd.f32 %v390_v7, %v373_v6 }
 0x176   :  { %v382_v13 = vadd.f32 %v381_v11, %v364_v10  ;;  %v973_v10 = vld [vmem:[%s1775_s7 + $0x10] sm:$0xff]  ;;  %v975_v11 = vld [vmem:[%s1775_s7 + $0x18] sm:$0xff] }
 0x177   :  { %v409_v17 = vadd.f32 %v408_v15, %v391_v12  ;;  %v210_v12 = vld [vmem:[#allocation12] sm:$0xff] }
 0x178   :  { %v400_v16 = vadd.f32 %v399_v14, %v382_v13 }
 0x17a   :  { %v410_v18 = vadd.f32 %v409_v17, %v400_v16 }
 0x17c   :  { %1021 = vtanh.f32 %v410_v18  ;;  %v977_v18 = vld [vmem:[%s1775_s7 + $0x20] sm:$0xff] }
 0x186   :  { %v1022_v19 = vpop.eup %1021 }
 0x187   :  { %412 = vst [vmem:[#allocation3] sm:$0xff] %v1022_v19 }
 0x18e   :  { %v958_v25 = vld [vmem:[#allocation3] ss:$0 sm:$0xff]  ;;  %v959_v26 = vld [vmem:[#allocation3 + $0x1] ss:$0 sm:$0xff]  ;;  %v960_v27 = vld [vmem:[#allocation3 + $0x2] ss:$0 sm:$0xff] }
 0x18f   :  { %v419_v28 = vmul.f32 %v958_v25, %v413_v20  ;;  %v428_v29 = vmul.f32 %v959_v26, %v422_v21  ;;  %v961_v30 = vld [vmem:[#allocation3 + $0x3] ss:$0 sm:$0xff]  ;;  %v437_v33 = vmul.f32 %v960_v27, %v431_v22 }
 0x190   :  { %v446_v31 = vmul.f32 %v961_v30, %v440_v23  ;;  %v572_v30 = vld [vmem:[#allocation14] sm:$0xff] }
 0x191   :  { %v420_v32 = vadd.f32 %v419_v28, %v208_v24 }
 0x192   :  { %v447_v35 = vadd.f32 %v446_v31, %v428_v29  ;;  %v590_v31 = vld [vmem:[#allocation14 + $0x10] sm:$0xff] }
 0x193   :  { %v438_v34 = vadd.f32 %v437_v33, %v420_v32  ;;  %v211_v32 = vld [vmem:[#allocation15] sm:$0xff] }
 0x195   :  { %v448_v36 = vadd.f32 %v447_v35, %v438_v34 }
 0x197   :  { %1023 = vtanh.f32 %v448_v36  ;;  %v581_v36 = vld [vmem:[#allocation14 + $0x8] sm:$0xff] }
 0x1a1   :  { %v1024_v37 = vpop.eup %1023 }
 0x1a2   :  { %450 = vst [vmem:[#allocation2] sm:$0xff] %v1024_v37 }
 0x1a9   :  { %v962_v43 = vld [vmem:[#allocation2] ss:$0 sm:$0xff]  ;;  %v963_v44 = vld [vmem:[#allocation2 + $0x1] ss:$0 sm:$0xff]  ;;  %v964_v45 = vld [vmem:[#allocation2 + $0x2] ss:$0 sm:$0xff] }
 0x1aa   :  { %v457_v47 = vmul.f32 %v962_v43, %v451_v38  ;;  %v466_v48 = vmul.f32 %v963_v44, %v460_v39  ;;  %v965_v49 = vld [vmem:[#allocation2 + $0x3] ss:$0 sm:$0xff]  ;;  %v967_v50 = vld [vmem:[#allocation2 + $0x5] ss:$0 sm:$0xff]  ;;  %v966_v53 = vld [vmem:[#allocation2 + $0x4] ss:$0 sm:$0xff]  ;;  %v475_v56 = vmul.f32 %v964_v45, %v469_v40 }
 0x1ab   :  { %v484_v52 = vmul.f32 %v965_v49, %v478_v41  ;;  %v502_v59 = vmul.f32 %v967_v50, %v496_v46  ;;  %v968_v60 = vld [vmem:[#allocation2 + $0x6] ss:$0 sm:$0xff]  ;;  %v969_v61 = vld [vmem:[#allocation2 + $0x7] ss:$0 sm:$0xff]  ;;  %v493_v63 = vmul.f32 %v966_v53, %v487_v51  ;;  %v602_v45 = vld [vmem:[#allocation17 + $0x8] sm:$0xff] }
 0x1ac   :  { %v458_v55 = vadd.f32 %v457_v47, %v209_v42  ;;  %v511_v2 = vmul.f32 %v968_v60, %v505_v54  ;;  %v520_v3 = vmul.f32 %v969_v61, %v514_v57  ;;  %v601_v44 = vld [vmem:[#allocation17] sm:$0xff]  ;;  %v613_v46 = vld [vmem:[#allocation17 + $0x10] sm:$0xff]  ;;  %v614_v47 = vld [vmem:[#allocation17 + $0x18] sm:$0xff] }
 0x1ad   :  { %v485_v58 = vadd.f32 %v484_v52, %v466_v48  ;;  %v625_v48 = vld [vmem:[#allocation17 + $0x20] sm:$0xff]  ;;  %v626_v49 = vld [vmem:[#allocation17 + $0x28] sm:$0xff]  ;;  %v637_v50 = vld [vmem:[#allocation17 + $0x30] sm:$0xff] }
 0x1ae   :  { %v476_v62 = vadd.f32 %v475_v56, %v458_v55  ;;  %v638_v51 = vld [vmem:[#allocation17 + $0x38] sm:$0xff]  ;;  %v649_v52 = vld [vmem:[#allocation17 + $0x40] sm:$0xff] }
 0x1af   :  { %v503_v0 = vadd.f32 %v502_v59, %v485_v58  ;;  %v212_v53 = vld [vmem:[%s1780_s12] sm:$0xff]  ;;  %v213_v54 = vld [vmem:[%s1780_s12 + $0x8] sm:$0xff]  ;;  %v650_v58 = vld [vmem:[#allocation17 + $0x48] sm:$0xff] }
 0x1b0   :  { %v494_v1 = vadd.f32 %v493_v63, %v476_v62 }
 0x1b1   :  { %v521_v5 = vadd.f32 %v520_v3, %v503_v0 }
 0x1b2   :  { %v512_v4 = vadd.f32 %v511_v2, %v494_v1  ;;  %v661_v1 = vld [vmem:[#allocation17 + $0x50] sm:$0xff]  ;;  %v662_v2 = vld [vmem:[#allocation17 + $0x58] sm:$0xff] }
 0x1b4   :  { %v522_v6 = vadd.f32 %v521_v5, %v512_v4 }
 0x1b6   :  { %1025 = vtanh.f32 %v522_v6 }
 0x1c0   :  { %v1026_v7 = vpop.eup %1025 }
 0x1c1   :  { %524 = vst [vmem:[#allocation3] sm:$0xff] %v1026_v7 }
 0x1c8   :  { %v970_v13 = vld [vmem:[#allocation3] ss:$0 sm:$0xff]  ;;  %v972_v14 = vld [vmem:[#allocation3 + $0x1] ss:$0 sm:$0xff]  ;;  %v974_v15 = vld [vmem:[#allocation3 + $0x2] ss:$0 sm:$0xff] }
 0x1c9   :  { %v531_v16 = vmul.f32 %v970_v13, %v525_v8  ;;  %v976_v17 = vld [vmem:[#allocation3 + $0x3] ss:$0 sm:$0xff]  ;;  %v978_v19 = vld [vmem:[#allocation3 + $0x4] ss:$0 sm:$0xff]  ;;  %v540_v21 = vmul.f32 %v972_v14, %v971_v9  ;;  %v549_v22 = vmul.f32 %v974_v15, %v973_v10 }
 0x1ca   :  { %v558_v23 = vmul.f32 %v976_v17, %v975_v11  ;;  %v567_v25 = vmul.f32 %v978_v19, %v977_v18 }
 0x1cb   :  { %v532_v20 = vadd.f32 %v531_v16, %v210_v12 }
 0x1cc   :  { %v559_v26 = vadd.f32 %v558_v23, %v540_v21 }
 0x1cd   :  { %v550_v24 = vadd.f32 %v549_v22, %v532_v20 }
 0x1cf   :  { %v568_v27 = vadd.f32 %v567_v25, %v550_v24 }
 0x1d1   :  { %v569_v28 = vadd.f32 %v568_v27, %v559_v26  ;;  %v678_v26 = vld [vmem:[#allocation18] sm:$0xff]  ;;  %v687_v27 = vld [vmem:[#allocation18 + $0x8] sm:$0xff] }
 0x1d3   :  { %1027 = vtanh.f32 %v569_v28  ;;  %v696_v28 = vld [vmem:[#allocation18 + $0x10] sm:$0xff] }
 0x1dd   :  { %v1028_v29 = vpop.eup %1027 }
 0x1de   :  { %571 = vst [vmem:[#allocation2] sm:$0xff] %v1028_v29  ;;  %v705_v29 = vld [vmem:[#allocation18 + $0x18] sm:$0xff] }
 0x1e5   :  { %v979_v33 = vld [vmem:[#allocation2] ss:$0 sm:$0xff]  ;;  %v981_v34 = vld [vmem:[#allocation2 + $0x2] ss:$0 sm:$0xff]  ;;  %v980_v37 = vld [vmem:[#allocation2 + $0x1] ss:$0 sm:$0xff] }
 0x1e6   :  { %v578_v35 = vmul.f32 %v979_v33, %v572_v30  ;;  %v596_v39 = vmul.f32 %v981_v34, %v590_v31  ;;  %v587_v40 = vmul.f32 %v980_v37, %v581_v36  ;;  %v214_v30 = vld [vmem:[#allocation20] sm:$0xff]  ;;  %v723_v34 = vld [vmem:[#allocation18 + $0x28] sm:$0xff] }
 0x1e8   :  { %v579_v38 = vadd.f32 %v578_v35, %v211_v32 }
 0x1ea   :  { %v597_v41 = vadd.f32 %v596_v39, %v579_v38  ;;  %v714_v39 = vld [vmem:[#allocation18 + $0x20] sm:$0xff] }
 0x1ec   :  { %v598_v42 = vadd.f32 %v597_v41, %v587_v40 }
 0x1ee   :  { %1029 = vtanh.f32 %v598_v42  ;;  %v741_v42 = vld [vmem:[#allocation18 + $0x38] sm:$0xff] }
 0x1f8   :  { %v1030_v43 = vpop.eup %1029 }
 0x1f9   :  { %600 = vst [vmem:[#allocation3] sm:$0xff] %v1030_v43 }
 0x200   :  { %v982_v55 = vld [vmem:[#allocation3] ss:$0 sm:$0xff]  ;;  %v983_v56 = vld [vmem:[#allocation3 + $0x1] ss:$0 sm:$0xff]  ;;  %v984_v57 = vld [vmem:[#allocation3 + $0x2] ss:$0 sm:$0xff] }
 0x201   :  { %v608_v59 = vmul.f32 %v982_v55, %v601_v44  ;;  %v609_v60 = vmul.f32 %v982_v55, %v602_v45  ;;  %v620_v61 = vmul.f32 %v983_v56, %v613_v46  ;;  %v621_v62 = vmul.f32 %v983_v56, %v614_v47  ;;  %v985_v63 = vld [vmem:[#allocation3 + $0x3] ss:$0 sm:$0xff]  ;;  %v986_v0 = vld [vmem:[#allocation3 + $0x4] ss:$0 sm:$0xff]  ;;  %v987_v5 = vld [vmem:[#allocation3 + $0x5] ss:$0 sm:$0xff] }
 0x202   :  { %v644_v3 = vmul.f32 %v985_v63, %v637_v50  ;;  %v645_v4 = vmul.f32 %v985_v63, %v638_v51  ;;  %v632_v8 = vmul.f32 %v984_v57, %v625_v48  ;;  %v633_v9 = vmul.f32 %v984_v57, %v626_v49  ;;  %v732_v46 = vld [vmem:[#allocation18 + $0x30] sm:$0xff]  ;;  %v750_v50 = vld [vmem:[#allocation18 + $0x40] sm:$0xff] }
 0x203   :  { %v610_v6 = vadd.f32 %v608_v59, %v212_v53  ;;  %v611_v7 = vadd.f32 %v609_v60, %v213_v54  ;;  %v656_v12 = vmul.f32 %v986_v0, %v649_v52  ;;  %v657_v13 = vmul.f32 %v986_v0, %v650_v58  ;;  %v759_v53 = vld [vmem:[#allocation18 + $0x48] sm:$0xff] }
 0x204   :  { %v646_v10 = vadd.f32 %v644_v3, %v620_v61  ;;  %v647_v11 = vadd.f32 %v645_v4, %v621_v62  ;;  %v668_v16 = vmul.f32 %v987_v5, %v661_v1  ;;  %v669_v17 = vmul.f32 %v987_v5, %v662_v2  ;;  %v770_v4 = vld [vmem:[#allocation21] sm:$0xff]  ;;  %v782_v5 = vld [vmem:[#allocation21 + $0x10] sm:$0xff] }
 0x205   :  { %v634_v14 = vadd.f32 %v632_v8, %v610_v6  ;;  %v635_v15 = vadd.f32 %v633_v9, %v611_v7  ;;  %v215_v6 = vld [vmem:[%s1784_s16] sm:$0xff]  ;;  %v806_v8 = vld [vmem:[#allocation21 + $0x30] sm:$0xff]  ;;  %v771_v9 = vld [vmem:[#allocation21 + $0x8] sm:$0xff] }
 0x206   :  { %v670_v20 = vadd.f32 %v668_v16, %v646_v10  ;;  %v671_v21 = vadd.f32 %v669_v17, %v647_v11  ;;  %v794_v7 = vld [vmem:[#allocation21 + $0x20] sm:$0xff]  ;;  %v830_v10 = vld [vmem:[#allocation21 + $0x50] sm:$0xff]  ;;  %v216_v11 = vld [vmem:[%s1784_s16 + $0x8] sm:$0xff] }
 0x207   :  { %v658_v18 = vadd.f32 %v656_v12, %v634_v14  ;;  %v659_v19 = vadd.f32 %v657_v13, %v635_v15  ;;  %v783_v12 = vld [vmem:[#allocation21 + $0x18] sm:$0xff]  ;;  %v795_v13 = vld [vmem:[#allocation21 + $0x28] sm:$0xff] }
 0x209   :  { %v672_v22 = vadd.f32 %v670_v20, %v658_v18  ;;  %v673_v23 = vadd.f32 %v671_v21, %v659_v19 }
 0x20b   :  { %1031 = vtanh.f32 %v672_v22  ;;  %v807_v22 = vld [vmem:[#allocation21 + $0x38] sm:$0xff] }
 0x20c   :  { %1033 = vtanh.f32 %v673_v23 }
 0x215   :  { %v1032_v24 = vpop.eup %1031 }
 0x216   :  { %v1034_v25 = vpop.eup %1033  ;;  %676 = vst [vmem:[#allocation2] sm:$0xff] %v1032_v24  ;;  %v818_v24 = vld [vmem:[#allocation21 + $0x40] sm:$0xff] }
 0x217   :  { %677 = vst [vmem:[#allocation2 + $0x8] sm:$0xff] %v1034_v25 }
 0x21d   :  { %v988_v31 = vld [vmem:[#allocation2] ss:$0 sm:$0xff]  ;;  %v989_v32 = vld [vmem:[#allocation2 + $0x1] ss:$0 sm:$0xff]  ;;  %v990_v33 = vld [vmem:[#allocation2 + $0x2] ss:$0 sm:$0xff] }
 0x21e   :  { %v684_v35 = vmul.f32 %v988_v31, %v678_v26  ;;  %v693_v36 = vmul.f32 %v989_v32, %v687_v27  ;;  %v991_v37 = vld [vmem:[#allocation2 + $0x3] ss:$0 sm:$0xff]  ;;  %v993_v38 = vld [vmem:[#allocation2 + $0x5] ss:$0 sm:$0xff]  ;;  %v992_v41 = vld [vmem:[#allocation2 + $0x4] ss:$0 sm:$0xff]  ;;  %v702_v44 = vmul.f32 %v990_v33, %v696_v28 }
 0x21f   :  { %v711_v40 = vmul.f32 %v991_v37, %v705_v29  ;;  %v995_v45 = vld [vmem:[#allocation2 + $0x7] ss:$0 sm:$0xff]  ;;  %v729_v48 = vmul.f32 %v993_v38, %v723_v34  ;;  %v994_v49 = vld [vmem:[#allocation2 + $0x6] ss:$0 sm:$0xff]  ;;  %v720_v52 = vmul.f32 %v992_v41, %v714_v39  ;;  %v996_v56 = vld [vmem:[#allocation2 + $0x8] ss:$0 sm:$0xff] }
 0x220   :  { %v685_v43 = vadd.f32 %v684_v35, %v214_v30  ;;  %v747_v55 = vmul.f32 %v995_v45, %v741_v42  ;;  %v997_v57 = vld [vmem:[#allocation2 + $0x9] ss:$0 sm:$0xff]  ;;  %v738_v59 = vmul.f32 %v994_v49, %v732_v46  ;;  %v756_v62 = vmul.f32 %v996_v56, %v750_v50  ;;  %v842_v29 = vld [vmem:[#allocation21 + $0x60] sm:$0xff]  ;;  %v819_v32 = vld [vmem:[#allocation21 + $0x48] sm:$0xff] }
 0x221   :  { %v712_v47 = vadd.f32 %v711_v40, %v693_v36  ;;  %v765_v63 = vmul.f32 %v997_v57, %v759_v53  ;;  %v854_v30 = vld [vmem:[#allocation21 + $0x70] sm:$0xff]  ;;  %v831_v39 = vld [vmem:[#allocation21 + $0x58] sm:$0xff]  ;;  %v843_v46 = vld [vmem:[#allocation21 + $0x68] sm:$0xff] }
 0x222   :  { %v703_v51 = vadd.f32 %v702_v44, %v685_v43 }
 0x223   :  { %v730_v54 = vadd.f32 %v729_v48, %v712_v47 }
 0x224   :  { %v721_v58 = vadd.f32 %v720_v52, %v703_v51  ;;  %v855_v52 = vld [vmem:[#allocation21 + $0x78] sm:$0xff] }
 0x225   :  { %v748_v60 = vadd.f32 %v747_v55, %v730_v54 }
 0x226   :  { %v739_v61 = vadd.f32 %v738_v59, %v721_v58 }
 0x227   :  { %v766_v1 = vadd.f32 %v765_v63, %v748_v60 }
 0x228   :  { %v757_v0 = vadd.f32 %v756_v62, %v739_v61 }
 0x22a   :  { %v767_v2 = vadd.f32 %v766_v1, %v757_v0 }
 0x22c   :  { %1035 = vtanh.f32 %v767_v2 }
 0x236   :  { %v1036_v3 = vpop.eup %1035 }
 0x237   :  { %769 = vst [vmem:[#allocation3] sm:$0xff] %v1036_v3 }
 0x23e   :  { %v998_v14 = vld [vmem:[#allocation3] ss:$0 sm:$0xff]  ;;  %v999_v15 = vld [vmem:[#allocation3 + $0x1] ss:$0 sm:$0xff]  ;;  %v1000_v16 = vld [vmem:[#allocation3 + $0x2] ss:$0 sm:$0xff] }
 0x23f   :  { %v777_v17 = vmul.f32 %v998_v14, %v770_v4  ;;  %v789_v18 = vmul.f32 %v999_v15, %v782_v5  ;;  %v1001_v19 = vld [vmem:[#allocation3 + $0x3] ss:$0 sm:$0xff]  ;;  %v1003_v20 = vld [vmem:[#allocation3 + $0x5] ss:$0 sm:$0xff]  ;;  %v778_v21 = vmul.f32 %v998_v14, %v771_v9  ;;  %v1002_v25 = vld [vmem:[#allocation3 + $0x4] ss:$0 sm:$0xff]  ;;  %v790_v26 = vmul.f32 %v999_v15, %v783_v12 }
 0x240   :  { %v813_v23 = vmul.f32 %v1001_v19, %v806_v8  ;;  %v801_v28 = vmul.f32 %v1000_v16, %v794_v7  ;;  %v837_v34 = vmul.f32 %v1003_v20, %v830_v10  ;;  %v1004_v35 = vld [vmem:[#allocation3 + $0x6] ss:$0 sm:$0xff]  ;;  %v1005_v36 = vld [vmem:[#allocation3 + $0x7] ss:$0 sm:$0xff]  ;;  %v802_v37 = vmul.f32 %v1000_v16, %v795_v13 }
 0x241   :  { %v779_v27 = vadd.f32 %v777_v17, %v215_v6  ;;  %v780_v31 = vadd.f32 %v778_v21, %v216_v11  ;;  %v814_v38 = vmul.f32 %v1001_v19, %v807_v22  ;;  %v825_v41 = vmul.f32 %v1002_v25, %v818_v24 }
 0x242   :  { %v815_v33 = vadd.f32 %v813_v23, %v789_v18  ;;  %v826_v45 = vmul.f32 %v1002_v25, %v819_v32  ;;  %v849_v48 = vmul.f32 %v1004_v35, %v842_v29  ;;  %v861_v49 = vmul.f32 %v1005_v36, %v854_v30 }
 0x243   :  { %v803_v40 = vadd.f32 %v801_v28, %v779_v27  ;;  %v804_v43 = vadd.f32 %v802_v37, %v780_v31  ;;  %v816_v44 = vadd.f32 %v814_v38, %v790_v26  ;;  %v838_v50 = vmul.f32 %v1003_v20, %v831_v39 }
 0x244   :  { %v839_v42 = vadd.f32 %v837_v34, %v815_v33  ;;  %v850_v56 = vmul.f32 %v1004_v35, %v843_v46  ;;  %v862_v59 = vmul.f32 %v1005_v36, %v855_v52 }
 0x245   :  { %v827_v47 = vadd.f32 %v825_v41, %v803_v40  ;;  %v828_v51 = vadd.f32 %v826_v45, %v804_v43  ;;  %v840_v55 = vadd.f32 %v838_v50, %v816_v44 }
 0x246   :  { %v863_v54 = vadd.f32 %v861_v49, %v839_v42 }
 0x247   :  { %v851_v53 = vadd.f32 %v849_v48, %v827_v47  ;;  %v852_v58 = vadd.f32 %v850_v56, %v828_v51  ;;  %v864_v60 = vadd.f32 %v862_v59, %v840_v55 }
 0x249   :  { %v865_v57 = vadd.f32 %v863_v54, %v851_v53  ;;  %v866_v61 = vadd.f32 %v864_v60, %v852_v58 }
 0x24b   :  { %867 = vxpose.xlu1.b32.start [1/2] (short) %v865_v57, 128 }
 0x24f   :  { %868 = vxpose.xlu1.b32.end [2/2] (short) %v866_v61, 128 }
 0x2cb   :  { %v883_v62 = vpop.trf.xlu1 }
 0x2cc   :  { %900 = vst.msk [vmem:[%s1794_s13] sm:$0xff] %vm899_vm0, %v883_v62 }
 0x2cf   :  { %v884_v63 = vpop.trf.xlu1 }
 0x2d0   :  { %901 = vst.msk [vmem:[%s1794_s13 + $0x8] sm:$0xff] %vm899_vm0, %v884_v63 }
 0x2d3   :  { %v885_v0 = vpop.trf.xlu1 }
 0x2d4   :  { %902 = vst.msk [vmem:[%s1794_s13 + $0x10] sm:$0xff] %vm899_vm0, %v885_v0 }
 0x2d7   :  { %v886_v1 = vpop.trf.xlu1 }
 0x2d8   :  { %903 = vst.msk [vmem:[%s1794_s13 + $0x18] sm:$0xff] %vm899_vm0, %v886_v1 }
 0x2db   :  { %v887_v2 = vpop.trf.xlu1 }
 0x2dc   :  { %904 = vst.msk [vmem:[%s1794_s13 + $0x20] sm:$0xff] %vm899_vm0, %v887_v2 }
 0x2df   :  { %v888_v3 = vpop.trf.xlu1 }
 0x2e0   :  { %905 = vst.msk [vmem:[%s1794_s13 + $0x28] sm:$0xff] %vm899_vm0, %v888_v3 }
 0x2e3   :  { %v889_v4 = vpop.trf.xlu1 }
 0x2e4   :  { %906 = vst.msk [vmem:[%s1794_s13 + $0x30] sm:$0xff] %vm899_vm0, %v889_v4 }
 0x2e7   :  { %v890_v5 = vpop.trf.xlu1 }
 0x2e8   :  { %907 = vst.msk [vmem:[%s1794_s13 + $0x38] sm:$0xff] %vm899_vm0, %v890_v5 }
 0x2eb   :  { %v891_v6 = vpop.trf.xlu1 }
 0x2ec   :  { %908 = vst.msk [vmem:[%s1794_s13 + $0x40] sm:$0xff] %vm899_vm0, %v891_v6 }
 0x2ef   :  { %v892_v7 = vpop.trf.xlu1 }
 0x2f0   :  { %909 = vst.msk [vmem:[%s1794_s13 + $0x48] sm:$0xff] %vm899_vm0, %v892_v7 }
 0x2f3   :  { %v893_v8 = vpop.trf.xlu1 }
 0x2f4   :  { %910 = vst.msk [vmem:[%s1794_s13 + $0x50] sm:$0xff] %vm899_vm0, %v893_v8 }
 0x2f7   :  { %v894_v9 = vpop.trf.xlu1 }
 0x2f8   :  { %911 = vst.msk [vmem:[%s1794_s13 + $0x58] sm:$0xff] %vm899_vm0, %v894_v9 }
 0x2fb   :  { %v895_v10 = vpop.trf.xlu1 }
 0x2fc   :  { %912 = vst.msk [vmem:[%s1794_s13 + $0x60] sm:$0xff] %vm899_vm0, %v895_v10 }
 0x2ff   :  { %v896_v11 = vpop.trf.xlu1 }
 0x300   :  { %913 = vst.msk [vmem:[%s1794_s13 + $0x68] sm:$0xff] %vm899_vm0, %v896_v11 }
 0x303   :  { %v897_v12 = vpop.trf.xlu1 }
 0x304   :  { %914 = vst.msk [vmem:[%s1794_s13 + $0x70] sm:$0xff] %vm899_vm0, %v897_v12 }
 0x307   :  { %v898_v13 = vpop.trf.xlu1 }
 0x308   :  { %915 = vst.msk [vmem:[%s1794_s13 + $0x78] sm:$0xff] %vm899_vm0, %v898_v13 }
 0x309   :  { %920 = vsyncpa [#allocation5], 1 }
 0x30a   :  { %921 = vsyncpa [#allocation7], 1 }
 0x30b   :  { %922 = vsyncpa [#allocation10], 1 }
 0x30c   :  { %923 = vsyncpa [#allocation13], 1 }
 0x30d   :  { %924 = vsyncpa [#allocation16], 1 }
 0x30e   :  { %925 = vsyncpa [#allocation19], 1 }
 0x30f   :  { %926 = vsyncpa [#allocation22], 1 }

</bundles_post_ra>
